<compile_context>
chip_gen: v6e
topology: v6e:2x2x1
jax: 0.10.0
libtpu: 0.0.40
codegen_flags: <defaults>
</compile_context>

<pallas_src>
import jax
import jax.numpy as jnp
from jax import lax
from jax.experimental import pallas as pl
from jax.experimental.pallas import tpu as pltpu

_HIDDEN = 50          # real LSTM hidden size (nn.LSTM(hidden_size=50))
_HP = 64              # padded hidden size used in the kernel (lane friendly)
_IN_LSTM = 32         # LSTM input size (= conv2 out channels)

# Row offsets inside the packed LSTM/FC weight slab (all 8-aligned).
_OFF_WI0 = 0                       # (32, 4*Hp)
_OFF_WH0 = _OFF_WI0 + _IN_LSTM     # (Hp, 4*Hp)
_OFF_WI1 = _OFF_WH0 + _HP          # (Hp, 4*Hp)
_OFF_WH1 = _OFF_WI1 + _HP          # (Hp, 4*Hp)
_OFF_B0 = _OFF_WH1 + _HP           # row 224 (band 224:232)
_OFF_B1 = _OFF_B0 + 8              # row 232
_OFF_WF = _OFF_B1 + 8              # (Hp, 4*Hp), fc weight zero-padded to 4*Hp cols
_OFF_BF = _OFF_WF + _HP            # row 304
_SLAB_ROWS = _OFF_BF + 8           # 312


# ---------------------------------------------------------------------------
# Host-side (wrapper) 0/1 selection matrices over the merged (BB*T) axis.
# ---------------------------------------------------------------------------
def _shift_matrix(bb, t, delta):
    """Out row p takes in row p+delta; zero at per-sample boundaries (pad=1)."""
    n = bb * t
    row = jnp.arange(n)
    l = row % t
    src = row + delta
    valid = (l + delta >= 0) & (l + delta <= t - 1)
    col = jnp.arange(n)
    return ((col[None, :] == src[:, None]) & valid[:, None]).astype(jnp.float32)


def _pool_matrix(bb, t_in, parity, time_major):
    """MaxPool(2) even/odd row selector; floor semantics for odd t_in.

    time_major=True also permutes the output rows from sample-major to
    time-major (row = r*bb + b) so the LSTM can slice contiguous (bb, C)
    blocks per timestep.
    """
    t_out = t_in // 2
    n_out = bb * t_out
    q = jnp.arange(n_out)
    if time_major:
        b = q % bb
        r = q // bb
    else:
        b = q // t_out
        r = q % t_out
    src = b * t_in + 2 * r + parity
    col = jnp.arange(bb * t_in)
    return (col[None, :] == src[:, None]).astype(jnp.float32)


# ---------------------------------------------------------------------------
# Fused forward kernel: BB samples per grid step.
# ---------------------------------------------------------------------------
def _cnn_lstm_kernel(x_ref, shift1_ref, pool1_ref, shift2_ref, pool2_ref,
                     w1_ref, b1_ref, w2_ref, b2_ref, lstm_ref, o_ref):
    f32 = jnp.float32
    Hp = _HP
    BB, out_dim = o_ref.shape
    T4 = pool2_ref.shape[1] // BB

    x = x_ref[...].astype(f32)                                  # (BB*T, D)

    # -------- conv1 (k=3, pad=1) + ReLU: per-tap matmuls, shift applied after
    t0 = jnp.dot(x, w1_ref[0], preferred_element_type=f32)
    t1 = jnp.dot(x, w1_ref[1], preferred_element_type=f32)
    t2 = jnp.dot(x, w1_ref[2], preferred_element_type=f32)
    y1 = jnp.maximum(
        jnp.dot(shift1_ref[0], t0, preferred_element_type=f32) + t1
        + jnp.dot(shift1_ref[1], t2, preferred_element_type=f32)
        + b1_ref[...], 0.0)                                     # (BB*T, 64)

    # -------- maxpool(2) #1
    p1v = jnp.maximum(jnp.dot(pool1_ref[0], y1, preferred_element_type=f32),
                      jnp.dot(pool1_ref[1], y1, preferred_element_type=f32))

    # -------- conv2 (k=3, pad=1) + ReLU: sum of three tap matmuls (no slab)
    v0 = jnp.dot(p1v, w2_ref[0], preferred_element_type=f32)
    v1 = jnp.dot(p1v, w2_ref[1], preferred_element_type=f32)
    v2 = jnp.dot(p1v, w2_ref[2], preferred_element_type=f32)
    y2 = jnp.maximum(
        jnp.dot(shift2_ref[0], v0, preferred_element_type=f32) + v1
        + jnp.dot(shift2_ref[1], v2, preferred_element_type=f32)
        + b2_ref[...], 0.0)                                     # (BB*T2, 32)

    # -------- maxpool(2) #2 fused with batch<->time transpose -> time-major
    p2v = jnp.maximum(jnp.dot(pool2_ref[0], y2, preferred_element_type=f32),
                      jnp.dot(pool2_ref[1], y2, preferred_element_type=f32))
    # p2v: (T4*BB, 32); rows [t*BB:(t+1)*BB] are timestep t for all BB samples.

    # -------- LSTM weights: one packed slab, static 8-aligned row slices.
    wi0 = lstm_ref[pl.ds(_OFF_WI0, _IN_LSTM), :]
    wh0 = lstm_ref[pl.ds(_OFF_WH0, Hp), :]
    wi1 = lstm_ref[pl.ds(_OFF_WI1, Hp), :]
    wh1 = lstm_ref[pl.ds(_OFF_WH1, Hp), :]
    b0 = lstm_ref[pl.ds(_OFF_B0, 1), :]
    b1l = lstm_ref[pl.ds(_OFF_B1, 1), :]
    wf = lstm_ref[pl.ds(_OFF_WF, Hp), :]
    bf = lstm_ref[pl.ds(_OFF_BF, 1), :]

    # Hoisted layer-0 input projection (one batched matmul, no scratch).
    proj = jnp.dot(p2v, wi0, preferred_element_type=f32) + b0   # (T4*BB, 4*Hp)

    def act(gates, c):
        i_g = jax.nn.sigmoid(gates[:, 0:Hp])
        f_g = jax.nn.sigmoid(gates[:, Hp:2 * Hp])
        g_g = jnp.tanh(gates[:, 2 * Hp:3 * Hp])
        o_g = jax.nn.sigmoid(gates[:, 3 * Hp:4 * Hp])
        c_new = f_g * c + i_g * g_g
        return o_g * jnp.tanh(c_new), c_new

    z = jnp.zeros((BB, Hp), f32)
    h0, c0, h1, c1 = z, z, z, z
    # TODO(synk): for very long sequences switch this full static unroll to a
    # partially-unrolled lax.fori_loop to bound code size / vreg pressure.
    for t in range(T4):
        g0 = proj[t * BB:(t + 1) * BB, :] + jnp.dot(
            h0, wh0, preferred_element_type=f32)
        h0, c0 = act(g0, c0)
        g1 = (jnp.dot(h0, wi1, preferred_element_type=f32)
              + jnp.dot(h1, wh1, preferred_element_type=f32) + b1l)
        h1, c1 = act(g1, c1)

    # -------- final Linear on the last timestep's layer-2 hidden state
    out = jnp.dot(h1, wf, preferred_element_type=f32) + bf      # (BB, 4*Hp)
    o_ref[...] = out[:, 0:out_dim].astype(o_ref.dtype)


# ---------------------------------------------------------------------------
# Weight re-packing (PyTorch layout -> kernel layout).
# ---------------------------------------------------------------------------
def _prep_conv(p):
    f32 = jnp.float32
    w1 = jnp.transpose(p["conv1_w"], (2, 1, 0)).astype(f32)      # (3, D, 64)
    b1 = p["conv1_b"].reshape(1, -1).astype(f32)                 # (1, 64)
    w2 = jnp.transpose(p["conv2_w"], (2, 1, 0)).astype(f32)      # (3, 64, 32)
    b2 = p["conv2_b"].reshape(1, -1).astype(f32)                 # (1, 32)
    return w1, b1, w2, b2


def _prep_lstm_slab(p, out_dim, hidden=_HIDDEN):
    H, Hp = hidden, _HP
    f32 = jnp.float32

    def gate_cols(w):                       # (4H, K) -> (K, 4Hp) per-gate cols
        K = w.shape[1]
        out = jnp.zeros((K, 4 * Hp), f32)
        for g in range(4):
            out = out.at[:, g * Hp:g * Hp + H].set(
                w[g * H:(g + 1) * H, :].T.astype(f32))
        return out

    def gate_bias(b):                       # (4H,) -> (1, 4Hp)
        out = jnp.zeros((1, 4 * Hp), f32)
        for g in range(4):
            out = out.at[0, g * Hp:g * Hp + H].set(
                b[g * H:(g + 1) * H].astype(f32))
        return out

    def pad_rows(w, rows):                  # zero-pad rows H -> rows
        return jnp.zeros((rows, w.shape[1]), f32).at[:w.shape[0], :].set(w)

    slab = jnp.zeros((_SLAB_ROWS, 4 * Hp), f32)
    slab = slab.at[_OFF_WI0:_OFF_WI0 + _IN_LSTM].set(gate_cols(p["w_ih_l0"]))
    slab = slab.at[_OFF_WH0:_OFF_WH0 + Hp].set(pad_rows(gate_cols(p["w_hh_l0"]), Hp))
    slab = slab.at[_OFF_WI1:_OFF_WI1 + Hp].set(pad_rows(gate_cols(p["w_ih_l1"]), Hp))
    slab = slab.at[_OFF_WH1:_OFF_WH1 + Hp].set(pad_rows(gate_cols(p["w_hh_l1"]), Hp))
    slab = slab.at[_OFF_B0:_OFF_B0 + 1].set(gate_bias(p["b_ih_l0"] + p["b_hh_l0"]))
    slab = slab.at[_OFF_B1:_OFF_B1 + 1].set(gate_bias(p["b_ih_l1"] + p["b_hh_l1"]))
    wf = jnp.zeros((Hp, 4 * Hp), f32).at[:H, :out_dim].set(p["fc_w"].T.astype(f32))
    slab = slab.at[_OFF_WF:_OFF_WF + Hp].set(wf)
    bf = jnp.zeros((1, 4 * Hp), f32).at[0, :out_dim].set(p["fc_b"].astype(f32))
    slab = slab.at[_OFF_BF:_OFF_BF + 1].set(bf)
    return slab


def _rep(shape):
    nd = len(shape)
    return pl.BlockSpec(shape, lambda i: (0,) * nd)


# ---------------------------------------------------------------------------
# Wrapper: batching, prep, pallas_call.
# ---------------------------------------------------------------------------
def cnn_lstm_forward(x, params, hidden=_HIDDEN, block_batch=8):
    B, T, D = x.shape
    assert T >= 4, "need at least 4 timesteps (two MaxPool(2) stages)"
    assert hidden <= _HP

    BB = min(block_batch, B)
    Bp = ((B + BB - 1) // BB) * BB
    if Bp != B:
        x = jnp.concatenate([x, jnp.zeros((Bp - B, T, D), x.dtype)], axis=0)
    T2 = T // 2
    T4 = T2 // 2
    BBT, BBT2, BBT4 = BB * T, BB * T2, BB * T4

    w1, b1, w2, b2 = _prep_conv(params)
    out_dim = params["fc_b"].shape[0]
    lstm_slab = _prep_lstm_slab(params, out_dim, hidden)

    shift1 = jnp.stack([_shift_matrix(BB, T, -1), _shift_matrix(BB, T, +1)])
    pool1 = jnp.stack([_pool_matrix(BB, T, 0, False), _pool_matrix(BB, T, 1, False)])
    shift2 = jnp.stack([_shift_matrix(BB, T2, -1), _shift_matrix(BB, T2, +1)])
    pool2 = jnp.stack([_pool_matrix(BB, T2, 0, True), _pool_matrix(BB, T2, 1, True)])

    # Row-major collapse (B, T, D) -> (B*T, D) is layout-free in HBM; avoids
    # any in-kernel reshape.  Input stays in its native dtype (cast in-kernel).
    x2d = x.reshape(Bp * T, D)

    grid = (Bp // BB,)
    Hp = _HP
    flops_per_step = 2 * (
        BBT * D * 64 * 3 + 2 * BBT * BBT * 64 + 2 * BBT2 * BBT * 64
        + BBT2 * 64 * 32 * 3 + 2 * BBT2 * BBT2 * 32 + 2 * BBT4 * BBT2 * 32
        + BBT4 * 32 * 4 * Hp + T4 * 3 * BB * Hp * 4 * Hp + BB * Hp * 4 * Hp)
    trans_per_step = T4 * 2 * 5 * BB * Hp
    weight_bytes = 4 * int(shift1.size + pool1.size + shift2.size + pool2.size
                           + w1.size + b1.size + w2.size + b2.size
                           + lstm_slab.size)
    bytes_accessed = (int(x2d.size) * x2d.dtype.itemsize + weight_bytes
                      + Bp * out_dim * 4)

    out = pl.pallas_call(
        _cnn_lstm_kernel,
        out_shape=jax.ShapeDtypeStruct((Bp, out_dim), jnp.float32),
        grid=grid,
        in_specs=[
            pl.BlockSpec((BBT, D), lambda i: (i, 0)),
            _rep(shift1.shape), _rep(pool1.shape),
            _rep(shift2.shape), _rep(pool2.shape),
            _rep(w1.shape), _rep(b1.shape), _rep(w2.shape), _rep(b2.shape),
            _rep(lstm_slab.shape),
        ],
        out_specs=pl.BlockSpec((BB, out_dim), lambda i: (i, 0)),
        compiler_params=pltpu.CompilerParams(
            dimension_semantics=("parallel",)),
        cost_estimate=pl.CostEstimate(
            flops=int(flops_per_step * grid[0]),
            transcendentals=int(trans_per_step * grid[0]),
            bytes_accessed=int(bytes_accessed)),
    )(x2d, shift1, pool1, shift2, pool2, w1, b1, w2, b2, lstm_slab)
    return out[:B]


# ---------------------------------------------------------------------------
# Pure-JAX reference (same math, no Pallas) for the correctness check.
# ---------------------------------------------------------------------------
def reference_forward(x, p, hidden=_HIDDEN):
    def conv_relu(x, w, b):
        B, C_in, L = x.shape
        xp = jnp.pad(x, ((0, 0), (0, 0), (1, 1)))
        y = sum(jnp.einsum("oi,bil->bol", w[:, :, k], xp[:, :, k:k + L])
                for k in range(3))
        return jnp.maximum(y + b[None, :, None], 0.0)

    def pool(x):
        L = x.shape[-1] - (x.shape[-1] % 2)
        return jnp.maximum(x[:, :, 0:L:2], x[:, :, 1:L:2])

    def lstm_layer(seq, w_ih, w_hh, b_ih, b_hh):
        B = seq.shape[1]
        H = hidden
        h = jnp.zeros((B, H), jnp.float32)
        c = jnp.zeros((B, H), jnp.float32)
        outs = []
        for t in range(seq.shape[0]):
            gates = seq[t] @ w_ih.T + h @ w_hh.T + b_ih + b_hh
            i_g = jax.nn.sigmoid(gates[:, 0 * H:1 * H])
            f_g = jax.nn.sigmoid(gates[:, 1 * H:2 * H])
            g_g = jnp.tanh(gates[:, 2 * H:3 * H])
            o_g = jax.nn.sigmoid(gates[:, 3 * H:4 * H])
            c = f_g * c + i_g * g_g
            h = o_g * jnp.tanh(c)
            outs.append(h)
        return jnp.stack(outs, axis=0)

    h = jnp.transpose(x, (0, 2, 1))
    h = conv_relu(h, p["conv1_w"], p["conv1_b"])
    h = pool(h)
    h = conv_relu(h, p["conv2_w"], p["conv2_b"])
    h = pool(h)
    seq = jnp.transpose(h, (2, 0, 1))                       # (T', B, 32)
    seq = lstm_layer(seq, p["w_ih_l0"], p["w_hh_l0"], p["b_ih_l0"], p["b_hh_l0"])
    seq = lstm_layer(seq, p["w_ih_l1"], p["w_hh_l1"], p["b_ih_l1"], p["b_hh_l1"])
    return seq[-1] @ p["fc_w"].T + p["fc_b"]


def init_params(key, input_dim, output_dim, hidden=_HIDDEN):
    ks = jax.random.split(key, 14)
    u = lambda k, shape, s: jax.random.uniform(k, shape, jnp.float32, -s, s)
    s1 = 1.0 / jnp.sqrt(input_dim * 3.0)
    s2 = 1.0 / jnp.sqrt(64 * 3.0)
    sl = 1.0 / jnp.sqrt(float(hidden))
    return {
        "conv1_w": u(ks[0], (64, input_dim, 3), s1),
        "conv1_b": u(ks[1], (64,), s1),
        "conv2_w": u(ks[2], (32, 64, 3), s2),
        "conv2_b": u(ks[3], (32,), s2),
        "w_ih_l0": u(ks[4], (4 * hidden, 32), sl),
        "w_hh_l0": u(ks[5], (4 * hidden, hidden), sl),
        "b_ih_l0": u(ks[6], (4 * hidden,), sl),
        "b_hh_l0": u(ks[7], (4 * hidden,), sl),
        "w_ih_l1": u(ks[8], (4 * hidden, hidden), sl),
        "w_hh_l1": u(ks[9], (4 * hidden, hidden), sl),
        "b_ih_l1": u(ks[10], (4 * hidden,), sl),
        "b_hh_l1": u(ks[11], (4 * hidden,), sl),
        "fc_w": u(ks[12], (output_dim, hidden), sl),
        "fc_b": u(ks[13], (output_dim,), sl),
    }


if __name__ == "__main__":
    # B=16 with block_batch=8 -> grid of 2 blocks (both v7x TensorCores busy),
    # batched (M=8) LSTM recurrence inside each block.
    B, T, input_dim, output_dim = 16, 16, 4, 3
    key = jax.random.PRNGKey(0)
    kx, kp = jax.random.split(key)
    x = jax.random.normal(kx, (B, T, input_dim), jnp.float32)
    params = init_params(kp, input_dim, output_dim)

    out = jax.jit(cnn_lstm_forward)(x, params)
    out = jax.block_until_ready(out)

    ref = reference_forward(x, params)
    assert out.shape == (B, output_dim)
    assert jnp.allclose(out, ref, atol=2e-4, rtol=2e-4), (out, ref)
    print("KERNEL_OK")
</pallas_src>

<mosaic_0001>
module attributes {stable_mosaic.version = 11 : i64} {
  func.func @_cnn_lstm_kernel(%arg0: i32, %arg1: memref<128x4xf32, #tpu.memory_space<vmem>>, %arg2: memref<2x128x128xf32, #tpu.memory_space<vmem>>, %arg3: memref<2x64x128xf32, #tpu.memory_space<vmem>>, %arg4: memref<2x64x64xf32, #tpu.memory_space<vmem>>, %arg5: memref<2x32x64xf32, #tpu.memory_space<vmem>>, %arg6: memref<3x4x64xf32, #tpu.memory_space<vmem>>, %arg7: memref<1x64xf32, #tpu.memory_space<vmem>>, %arg8: memref<3x64x32xf32, #tpu.memory_space<vmem>>, %arg9: memref<1x32xf32, #tpu.memory_space<vmem>>, %arg10: memref<312x256xf32, #tpu.memory_space<vmem>>, %arg11: memref<8x3xf32, #tpu.memory_space<vmem>>) attributes {dimension_semantics = [#tpu.dimension_semantics<parallel>], iteration_bounds = array<i64: 2>, scalar_prefetch = 0 : i64, scratch_operands = 0 : i64, tpu.core_type = #tpu.core_type<tc>, window_params = [{transform_indices = @transform_0, window_bounds = array<i64: 128, 4>}, {pipeline_mode = #tpu.pipeline_mode<synchronous>, transform_indices = @transform_1, window_bounds = array<i64: 2, 128, 128>}, {pipeline_mode = #tpu.pipeline_mode<synchronous>, transform_indices = @transform_2, window_bounds = array<i64: 2, 64, 128>}, {pipeline_mode = #tpu.pipeline_mode<synchronous>, transform_indices = @transform_3, window_bounds = array<i64: 2, 64, 64>}, {pipeline_mode = #tpu.pipeline_mode<synchronous>, transform_indices = @transform_4, window_bounds = array<i64: 2, 32, 64>}, {pipeline_mode = #tpu.pipeline_mode<synchronous>, transform_indices = @transform_5, window_bounds = array<i64: 3, 4, 64>}, {pipeline_mode = #tpu.pipeline_mode<synchronous>, transform_indices = @transform_6, window_bounds = array<i64: 1, 64>}, {pipeline_mode = #tpu.pipeline_mode<synchronous>, transform_indices = @transform_7, window_bounds = array<i64: 3, 64, 32>}, {pipeline_mode = #tpu.pipeline_mode<synchronous>, transform_indices = @transform_8, window_bounds = array<i64: 1, 32>}, {pipeline_mode = #tpu.pipeline_mode<synchronous>, transform_indices = @transform_9, window_bounds = array<i64: 312, 256>}, {transform_indices = @transform_10, window_bounds = array<i64: 8, 3>}]} {
    %c0 = arith.constant 0 : index
    %c0_0 = arith.constant 0 : index
    %0 = vector.load %arg1[%c0, %c0_0] : memref<128x4xf32, #tpu.memory_space<vmem>>, vector<128x4xf32>
    %c0_1 = arith.constant 0 : index
    %c0_2 = arith.constant 0 : index
    %c0_3 = arith.constant 0 : index
    %1 = vector.load %arg6[%c0_1, %c0_2, %c0_3] : memref<3x4x64xf32, #tpu.memory_space<vmem>>, vector<1x4x64xf32>
    %2 = vector.shape_cast %1 : vector<1x4x64xf32> to vector<4x64xf32>
    %cst = arith.constant dense<0.000000e+00> : vector<128x64xf32>
    %3 = tpu.matmul %0, %2, %cst {dimension_numbers = #tpu.dot_dimension_numbers<[1], [0], [0], [1], [0, 0, 1, 1], [], []>} : vector<128x4xf32>, vector<4x64xf32>, vector<128x64xf32> -> vector<128x64xf32>
    %c1 = arith.constant 1 : index
    %c0_4 = arith.constant 0 : index
    %c0_5 = arith.constant 0 : index
    %4 = vector.load %arg6[%c1, %c0_4, %c0_5] : memref<3x4x64xf32, #tpu.memory_space<vmem>>, vector<1x4x64xf32>
    %5 = vector.shape_cast %4 : vector<1x4x64xf32> to vector<4x64xf32>
    %cst_6 = arith.constant dense<0.000000e+00> : vector<128x64xf32>
    %6 = tpu.matmul %0, %5, %cst_6 {dimension_numbers = #tpu.dot_dimension_numbers<[1], [0], [0], [1], [0, 0, 1, 1], [], []>} : vector<128x4xf32>, vector<4x64xf32>, vector<128x64xf32> -> vector<128x64xf32>
    %c2 = arith.constant 2 : index
    %c0_7 = arith.constant 0 : index
    %c0_8 = arith.constant 0 : index
    %7 = vector.load %arg6[%c2, %c0_7, %c0_8] : memref<3x4x64xf32, #tpu.memory_space<vmem>>, vector<1x4x64xf32>
    %8 = vector.shape_cast %7 : vector<1x4x64xf32> to vector<4x64xf32>
    %cst_9 = arith.constant dense<0.000000e+00> : vector<128x64xf32>
    %9 = tpu.matmul %0, %8, %cst_9 {dimension_numbers = #tpu.dot_dimension_numbers<[1], [0], [0], [1], [0, 0, 1, 1], [], []>} : vector<128x4xf32>, vector<4x64xf32>, vector<128x64xf32> -> vector<128x64xf32>
    %c0_10 = arith.constant 0 : index
    %c0_11 = arith.constant 0 : index
    %c0_12 = arith.constant 0 : index
    %10 = vector.load %arg2[%c0_10, %c0_11, %c0_12] : memref<2x128x128xf32, #tpu.memory_space<vmem>>, vector<1x128x128xf32>
    %11 = vector.shape_cast %10 : vector<1x128x128xf32> to vector<128x128xf32>
    %cst_13 = arith.constant dense<0.000000e+00> : vector<128x64xf32>
    %12 = tpu.matmul %11, %3, %cst_13 {dimension_numbers = #tpu.dot_dimension_numbers<[1], [0], [0], [1], [0, 0, 1, 1], [], []>} : vector<128x128xf32>, vector<128x64xf32>, vector<128x64xf32> -> vector<128x64xf32>
    %13 = arith.addf %12, %6 : vector<128x64xf32>
    %c1_14 = arith.constant 1 : index
    %c0_15 = arith.constant 0 : index
    %c0_16 = arith.constant 0 : index
    %14 = vector.load %arg2[%c1_14, %c0_15, %c0_16] : memref<2x128x128xf32, #tpu.memory_space<vmem>>, vector<1x128x128xf32>
    %15 = vector.shape_cast %14 : vector<1x128x128xf32> to vector<128x128xf32>
    %cst_17 = arith.constant dense<0.000000e+00> : vector<128x64xf32>
    %16 = tpu.matmul %15, %9, %cst_17 {dimension_numbers = #tpu.dot_dimension_numbers<[1], [0], [0], [1], [0, 0, 1, 1], [], []>} : vector<128x128xf32>, vector<128x64xf32>, vector<128x64xf32> -> vector<128x64xf32>
    %17 = arith.addf %13, %16 : vector<128x64xf32>
    %c0_18 = arith.constant 0 : index
    %c0_19 = arith.constant 0 : index
    %18 = vector.load %arg7[%c0_18, %c0_19] : memref<1x64xf32, #tpu.memory_space<vmem>>, vector<1x64xf32>
    %19 = vector.broadcast %18 : vector<1x64xf32> to vector<128x64xf32>
    %20 = arith.addf %17, %19 : vector<128x64xf32>
    %cst_20 = arith.constant 0.000000e+00 : f32
    %21 = vector.broadcast %cst_20 : f32 to vector<128x64xf32>
    %22 = arith.maximumf %20, %21 : vector<128x64xf32>
    %c0_21 = arith.constant 0 : index
    %c0_22 = arith.constant 0 : index
    %c0_23 = arith.constant 0 : index
    %23 = vector.load %arg3[%c0_21, %c0_22, %c0_23] : memref<2x64x128xf32, #tpu.memory_space<vmem>>, vector<1x64x128xf32>
    %24 = vector.shape_cast %23 : vector<1x64x128xf32> to vector<64x128xf32>
    %cst_24 = arith.constant dense<0.000000e+00> : vector<64x64xf32>
    %25 = tpu.matmul %24, %22, %cst_24 {dimension_numbers = #tpu.dot_dimension_numbers<[1], [0], [0], [1], [0, 0, 1, 1], [], []>} : vector<64x128xf32>, vector<128x64xf32>, vector<64x64xf32> -> vector<64x64xf32>
    %c1_25 = arith.constant 1 : index
    %c0_26 = arith.constant 0 : index
    %c0_27 = arith.constant 0 : index
    %26 = vector.load %arg3[%c1_25, %c0_26, %c0_27] : memref<2x64x128xf32, #tpu.memory_space<vmem>>, vector<1x64x128xf32>
    %27 = vector.shape_cast %26 : vector<1x64x128xf32> to vector<64x128xf32>
    %cst_28 = arith.constant dense<0.000000e+00> : vector<64x64xf32>
    %28 = tpu.matmul %27, %22, %cst_28 {dimension_numbers = #tpu.dot_dimension_numbers<[1], [0], [0], [1], [0, 0, 1, 1], [], []>} : vector<64x128xf32>, vector<128x64xf32>, vector<64x64xf32> -> vector<64x64xf32>
    %29 = arith.maximumf %25, %28 : vector<64x64xf32>
    %c0_29 = arith.constant 0 : index
    %c0_30 = arith.constant 0 : index
    %c0_31 = arith.constant 0 : index
    %30 = vector.load %arg8[%c0_29, %c0_30, %c0_31] : memref<3x64x32xf32, #tpu.memory_space<vmem>>, vector<1x64x32xf32>
    %31 = vector.shape_cast %30 : vector<1x64x32xf32> to vector<64x32xf32>
    %cst_32 = arith.constant dense<0.000000e+00> : vector<64x32xf32>
    %32 = tpu.matmul %29, %31, %cst_32 {dimension_numbers = #tpu.dot_dimension_numbers<[1], [0], [0], [1], [0, 0, 1, 1], [], []>} : vector<64x64xf32>, vector<64x32xf32>, vector<64x32xf32> -> vector<64x32xf32>
    %c1_33 = arith.constant 1 : index
    %c0_34 = arith.constant 0 : index
    %c0_35 = arith.constant 0 : index
    %33 = vector.load %arg8[%c1_33, %c0_34, %c0_35] : memref<3x64x32xf32, #tpu.memory_space<vmem>>, vector<1x64x32xf32>
    %34 = vector.shape_cast %33 : vector<1x64x32xf32> to vector<64x32xf32>
    %cst_36 = arith.constant dense<0.000000e+00> : vector<64x32xf32>
    %35 = tpu.matmul %29, %34, %cst_36 {dimension_numbers = #tpu.dot_dimension_numbers<[1], [0], [0], [1], [0, 0, 1, 1], [], []>} : vector<64x64xf32>, vector<64x32xf32>, vector<64x32xf32> -> vector<64x32xf32>
    %c2_37 = arith.constant 2 : index
    %c0_38 = arith.constant 0 : index
    %c0_39 = arith.constant 0 : index
    %36 = vector.load %arg8[%c2_37, %c0_38, %c0_39] : memref<3x64x32xf32, #tpu.memory_space<vmem>>, vector<1x64x32xf32>
    %37 = vector.shape_cast %36 : vector<1x64x32xf32> to vector<64x32xf32>
    %cst_40 = arith.constant dense<0.000000e+00> : vector<64x32xf32>
    %38 = tpu.matmul %29, %37, %cst_40 {dimension_numbers = #tpu.dot_dimension_numbers<[1], [0], [0], [1], [0, 0, 1, 1], [], []>} : vector<64x64xf32>, vector<64x32xf32>, vector<64x32xf32> -> vector<64x32xf32>
    %c0_41 = arith.constant 0 : index
    %c0_42 = arith.constant 0 : index
    %c0_43 = arith.constant 0 : index
    %39 = vector.load %arg4[%c0_41, %c0_42, %c0_43] : memref<2x64x64xf32, #tpu.memory_space<vmem>>, vector<1x64x64xf32>
    %40 = vector.shape_cast %39 : vector<1x64x64xf32> to vector<64x64xf32>
    %cst_44 = arith.constant dense<0.000000e+00> : vector<64x32xf32>
    %41 = tpu.matmul %40, %32, %cst_44 {dimension_numbers = #tpu.dot_dimension_numbers<[1], [0], [0], [1], [0, 0, 1, 1], [], []>} : vector<64x64xf32>, vector<64x32xf32>, vector<64x32xf32> -> vector<64x32xf32>
    %42 = arith.addf %41, %35 : vector<64x32xf32>
    %c1_45 = arith.constant 1 : index
    %c0_46 = arith.constant 0 : index
    %c0_47 = arith.constant 0 : index
    %43 = vector.load %arg4[%c1_45, %c0_46, %c0_47] : memref<2x64x64xf32, #tpu.memory_space<vmem>>, vector<1x64x64xf32>
    %44 = vector.shape_cast %43 : vector<1x64x64xf32> to vector<64x64xf32>
    %cst_48 = arith.constant dense<0.000000e+00> : vector<64x32xf32>
    %45 = tpu.matmul %44, %38, %cst_48 {dimension_numbers = #tpu.dot_dimension_numbers<[1], [0], [0], [1], [0, 0, 1, 1], [], []>} : vector<64x64xf32>, vector<64x32xf32>, vector<64x32xf32> -> vector<64x32xf32>
    %46 = arith.addf %42, %45 : vector<64x32xf32>
    %c0_49 = arith.constant 0 : index
    %c0_50 = arith.constant 0 : index
    %47 = vector.load %arg9[%c0_49, %c0_50] : memref<1x32xf32, #tpu.memory_space<vmem>>, vector<1x32xf32>
    %48 = vector.broadcast %47 : vector<1x32xf32> to vector<64x32xf32>
    %49 = arith.addf %46, %48 : vector<64x32xf32>
    %cst_51 = arith.constant 0.000000e+00 : f32
    %50 = vector.broadcast %cst_51 : f32 to vector<64x32xf32>
    %51 = arith.maximumf %49, %50 : vector<64x32xf32>
    %c0_52 = arith.constant 0 : index
    %c0_53 = arith.constant 0 : index
    %c0_54 = arith.constant 0 : index
    %52 = vector.load %arg5[%c0_52, %c0_53, %c0_54] : memref<2x32x64xf32, #tpu.memory_space<vmem>>, vector<1x32x64xf32>
    %53 = vector.shape_cast %52 : vector<1x32x64xf32> to vector<32x64xf32>
    %cst_55 = arith.constant dense<0.000000e+00> : vector<32x32xf32>
    %54 = tpu.matmul %53, %51, %cst_55 {dimension_numbers = #tpu.dot_dimension_numbers<[1], [0], [0], [1], [0, 0, 1, 1], [], []>} : vector<32x64xf32>, vector<64x32xf32>, vector<32x32xf32> -> vector<32x32xf32>
    %c1_56 = arith.constant 1 : index
    %c0_57 = arith.constant 0 : index
    %c0_58 = arith.constant 0 : index
    %55 = vector.load %arg5[%c1_56, %c0_57, %c0_58] : memref<2x32x64xf32, #tpu.memory_space<vmem>>, vector<1x32x64xf32>
    %56 = vector.shape_cast %55 : vector<1x32x64xf32> to vector<32x64xf32>
    %cst_59 = arith.constant dense<0.000000e+00> : vector<32x32xf32>
    %57 = tpu.matmul %56, %51, %cst_59 {dimension_numbers = #tpu.dot_dimension_numbers<[1], [0], [0], [1], [0, 0, 1, 1], [], []>} : vector<32x64xf32>, vector<64x32xf32>, vector<32x32xf32> -> vector<32x32xf32>
    %58 = arith.maximumf %54, %57 : vector<32x32xf32>
    %c0_60 = arith.constant 0 : index
    %c0_61 = arith.constant 0 : index
    %59 = vector.load %arg10[%c0_60, %c0_61] : memref<312x256xf32, #tpu.memory_space<vmem>>, vector<32x256xf32>
    %c32 = arith.constant 32 : index
    %c0_62 = arith.constant 0 : index
    %60 = vector.load %arg10[%c32, %c0_62] : memref<312x256xf32, #tpu.memory_space<vmem>>, vector<64x256xf32>
    %c96 = arith.constant 96 : index
    %c0_63 = arith.constant 0 : index
    %61 = vector.load %arg10[%c96, %c0_63] : memref<312x256xf32, #tpu.memory_space<vmem>>, vector<64x256xf32>
    %c160 = arith.constant 160 : index
    %c0_64 = arith.constant 0 : index
    %62 = vector.load %arg10[%c160, %c0_64] : memref<312x256xf32, #tpu.memory_space<vmem>>, vector<64x256xf32>
    %c224 = arith.constant 224 : index
    %c0_65 = arith.constant 0 : index
    %63 = vector.load %arg10[%c224, %c0_65] : memref<312x256xf32, #tpu.memory_space<vmem>>, vector<1x256xf32>
    %c232 = arith.constant 232 : index
    %c0_66 = arith.constant 0 : index
    %64 = vector.load %arg10[%c232, %c0_66] : memref<312x256xf32, #tpu.memory_space<vmem>>, vector<1x256xf32>
    %c240 = arith.constant 240 : index
    %c0_67 = arith.constant 0 : index
    %65 = vector.load %arg10[%c240, %c0_67] : memref<312x256xf32, #tpu.memory_space<vmem>>, vector<64x256xf32>
    %c304 = arith.constant 304 : index
    %c0_68 = arith.constant 0 : index
    %66 = vector.load %arg10[%c304, %c0_68] : memref<312x256xf32, #tpu.memory_space<vmem>>, vector<1x256xf32>
    %cst_69 = arith.constant dense<0.000000e+00> : vector<32x256xf32>
    %67 = tpu.matmul %58, %59, %cst_69 {dimension_numbers = #tpu.dot_dimension_numbers<[1], [0], [0], [1], [0, 0, 1, 1], [], []>} : vector<32x32xf32>, vector<32x256xf32>, vector<32x256xf32> -> vector<32x256xf32>
    %68 = vector.broadcast %63 : vector<1x256xf32> to vector<32x256xf32>
    %69 = arith.addf %67, %68 : vector<32x256xf32>
    %cst_70 = arith.constant 0.000000e+00 : f32
    %70 = vector.broadcast %cst_70 : f32 to vector<8x64xf32>
    %71 = vector.extract_strided_slice %69 {offsets = [0, 0], sizes = [8, 256], strides = [1, 1]} : vector<32x256xf32> to vector<8x256xf32>
    %cst_71 = arith.constant dense<0.000000e+00> : vector<8x256xf32>
    %72 = tpu.matmul %70, %60, %cst_71 {dimension_numbers = #tpu.dot_dimension_numbers<[1], [0], [0], [1], [0, 0, 1, 1], [], []>} : vector<8x64xf32>, vector<64x256xf32>, vector<8x256xf32> -> vector<8x256xf32>
    %73 = arith.addf %71, %72 : vector<8x256xf32>
    %74 = vector.extract_strided_slice %73 {offsets = [0, 0], sizes = [8, 64], strides = [1, 1]} : vector<8x256xf32> to vector<8x64xf32>
    %75 = arith.negf %74 : vector<8x64xf32>
    %76 = math.exp %75 : vector<8x64xf32>
    %cst_72 = arith.constant 1.000000e+00 : f32
    %77 = vector.broadcast %cst_72 : f32 to vector<8x64xf32>
    %78 = arith.addf %77, %76 : vector<8x64xf32>
    %79 = arith.divf %77, %78 : vector<8x64xf32>
    %80 = vector.extract_strided_slice %73 {offsets = [0, 64], sizes = [8, 64], strides = [1, 1]} : vector<8x256xf32> to vector<8x64xf32>
    %81 = arith.negf %80 : vector<8x64xf32>
    %82 = math.exp %81 : vector<8x64xf32>
    %cst_73 = arith.constant 1.000000e+00 : f32
    %83 = vector.broadcast %cst_73 : f32 to vector<8x64xf32>
    %84 = arith.addf %83, %82 : vector<8x64xf32>
    %85 = arith.divf %83, %84 : vector<8x64xf32>
    %86 = vector.extract_strided_slice %73 {offsets = [0, 128], sizes = [8, 64], strides = [1, 1]} : vector<8x256xf32> to vector<8x64xf32>
    %87 = math.tanh %86 : vector<8x64xf32>
    %88 = vector.extract_strided_slice %73 {offsets = [0, 192], sizes = [8, 64], strides = [1, 1]} : vector<8x256xf32> to vector<8x64xf32>
    %89 = arith.negf %88 : vector<8x64xf32>
    %90 = math.exp %89 : vector<8x64xf32>
    %cst_74 = arith.constant 1.000000e+00 : f32
    %91 = vector.broadcast %cst_74 : f32 to vector<8x64xf32>
    %92 = arith.addf %91, %90 : vector<8x64xf32>
    %93 = arith.divf %91, %92 : vector<8x64xf32>
    %94 = arith.mulf %85, %70 : vector<8x64xf32>
    %95 = arith.mulf %79, %87 : vector<8x64xf32>
    %96 = arith.addf %94, %95 : vector<8x64xf32>
    %97 = math.tanh %96 : vector<8x64xf32>
    %98 = arith.mulf %93, %97 : vector<8x64xf32>
    %cst_75 = arith.constant dense<0.000000e+00> : vector<8x256xf32>
    %99 = tpu.matmul %98, %61, %cst_75 {dimension_numbers = #tpu.dot_dimension_numbers<[1], [0], [0], [1], [0, 0, 1, 1], [], []>} : vector<8x64xf32>, vector<64x256xf32>, vector<8x256xf32> -> vector<8x256xf32>
    %cst_76 = arith.constant dense<0.000000e+00> : vector<8x256xf32>
    %100 = tpu.matmul %70, %62, %cst_76 {dimension_numbers = #tpu.dot_dimension_numbers<[1], [0], [0], [1], [0, 0, 1, 1], [], []>} : vector<8x64xf32>, vector<64x256xf32>, vector<8x256xf32> -> vector<8x256xf32>
    %101 = arith.addf %99, %100 : vector<8x256xf32>
    %102 = vector.broadcast %64 : vector<1x256xf32> to vector<8x256xf32>
    %103 = arith.addf %101, %102 : vector<8x256xf32>
    %104 = vector.extract_strided_slice %103 {offsets = [0, 0], sizes = [8, 64], strides = [1, 1]} : vector<8x256xf32> to vector<8x64xf32>
    %105 = arith.negf %104 : vector<8x64xf32>
    %106 = math.exp %105 : vector<8x64xf32>
    %cst_77 = arith.constant 1.000000e+00 : f32
    %107 = vector.broadcast %cst_77 : f32 to vector<8x64xf32>
    %108 = arith.addf %107, %106 : vector<8x64xf32>
    %109 = arith.divf %107, %108 : vector<8x64xf32>
    %110 = vector.extract_strided_slice %103 {offsets = [0, 64], sizes = [8, 64], strides = [1, 1]} : vector<8x256xf32> to vector<8x64xf32>
    %111 = arith.negf %110 : vector<8x64xf32>
    %112 = math.exp %111 : vector<8x64xf32>
    %cst_78 = arith.constant 1.000000e+00 : f32
    %113 = vector.broadcast %cst_78 : f32 to vector<8x64xf32>
    %114 = arith.addf %113, %112 : vector<8x64xf32>
    %115 = arith.divf %113, %114 : vector<8x64xf32>
    %116 = vector.extract_strided_slice %103 {offsets = [0, 128], sizes = [8, 64], strides = [1, 1]} : vector<8x256xf32> to vector<8x64xf32>
    %117 = math.tanh %116 : vector<8x64xf32>
    %118 = vector.extract_strided_slice %103 {offsets = [0, 192], sizes = [8, 64], strides = [1, 1]} : vector<8x256xf32> to vector<8x64xf32>
    %119 = arith.negf %118 : vector<8x64xf32>
    %120 = math.exp %119 : vector<8x64xf32>
    %cst_79 = arith.constant 1.000000e+00 : f32
    %121 = vector.broadcast %cst_79 : f32 to vector<8x64xf32>
    %122 = arith.addf %121, %120 : vector<8x64xf32>
    %123 = arith.divf %121, %122 : vector<8x64xf32>
    %124 = arith.mulf %115, %70 : vector<8x64xf32>
    %125 = arith.mulf %109, %117 : vector<8x64xf32>
    %126 = arith.addf %124, %125 : vector<8x64xf32>
    %127 = math.tanh %126 : vector<8x64xf32>
    %128 = arith.mulf %123, %127 : vector<8x64xf32>
    %129 = vector.extract_strided_slice %69 {offsets = [8, 0], sizes = [8, 256], strides = [1, 1]} : vector<32x256xf32> to vector<8x256xf32>
    %cst_80 = arith.constant dense<0.000000e+00> : vector<8x256xf32>
    %130 = tpu.matmul %98, %60, %cst_80 {dimension_numbers = #tpu.dot_dimension_numbers<[1], [0], [0], [1], [0, 0, 1, 1], [], []>} : vector<8x64xf32>, vector<64x256xf32>, vector<8x256xf32> -> vector<8x256xf32>
    %131 = arith.addf %129, %130 : vector<8x256xf32>
    %132 = vector.extract_strided_slice %131 {offsets = [0, 0], sizes = [8, 64], strides = [1, 1]} : vector<8x256xf32> to vector<8x64xf32>
    %133 = arith.negf %132 : vector<8x64xf32>
    %134 = math.exp %133 : vector<8x64xf32>
    %cst_81 = arith.constant 1.000000e+00 : f32
    %135 = vector.broadcast %cst_81 : f32 to vector<8x64xf32>
    %136 = arith.addf %135, %134 : vector<8x64xf32>
    %137 = arith.divf %135, %136 : vector<8x64xf32>
    %138 = vector.extract_strided_slice %131 {offsets = [0, 64], sizes = [8, 64], strides = [1, 1]} : vector<8x256xf32> to vector<8x64xf32>
    %139 = arith.negf %138 : vector<8x64xf32>
    %140 = math.exp %139 : vector<8x64xf32>
    %cst_82 = arith.constant 1.000000e+00 : f32
    %141 = vector.broadcast %cst_82 : f32 to vector<8x64xf32>
    %142 = arith.addf %141, %140 : vector<8x64xf32>
    %143 = arith.divf %141, %142 : vector<8x64xf32>
    %144 = vector.extract_strided_slice %131 {offsets = [0, 128], sizes = [8, 64], strides = [1, 1]} : vector<8x256xf32> to vector<8x64xf32>
    %145 = math.tanh %144 : vector<8x64xf32>
    %146 = vector.extract_strided_slice %131 {offsets = [0, 192], sizes = [8, 64], strides = [1, 1]} : vector<8x256xf32> to vector<8x64xf32>
    %147 = arith.negf %146 : vector<8x64xf32>
    %148 = math.exp %147 : vector<8x64xf32>
    %cst_83 = arith.constant 1.000000e+00 : f32
    %149 = vector.broadcast %cst_83 : f32 to vector<8x64xf32>
    %150 = arith.addf %149, %148 : vector<8x64xf32>
    %151 = arith.divf %149, %150 : vector<8x64xf32>
    %152 = arith.mulf %143, %96 : vector<8x64xf32>
    %153 = arith.mulf %137, %145 : vector<8x64xf32>
    %154 = arith.addf %152, %153 : vector<8x64xf32>
    %155 = math.tanh %154 : vector<8x64xf32>
    %156 = arith.mulf %151, %155 : vector<8x64xf32>
    %cst_84 = arith.constant dense<0.000000e+00> : vector<8x256xf32>
    %157 = tpu.matmul %156, %61, %cst_84 {dimension_numbers = #tpu.dot_dimension_numbers<[1], [0], [0], [1], [0, 0, 1, 1], [], []>} : vector<8x64xf32>, vector<64x256xf32>, vector<8x256xf32> -> vector<8x256xf32>
    %cst_85 = arith.constant dense<0.000000e+00> : vector<8x256xf32>
    %158 = tpu.matmul %128, %62, %cst_85 {dimension_numbers = #tpu.dot_dimension_numbers<[1], [0], [0], [1], [0, 0, 1, 1], [], []>} : vector<8x64xf32>, vector<64x256xf32>, vector<8x256xf32> -> vector<8x256xf32>
    %159 = arith.addf %157, %158 : vector<8x256xf32>
    %160 = vector.broadcast %64 : vector<1x256xf32> to vector<8x256xf32>
    %161 = arith.addf %159, %160 : vector<8x256xf32>
    %162 = vector.extract_strided_slice %161 {offsets = [0, 0], sizes = [8, 64], strides = [1, 1]} : vector<8x256xf32> to vector<8x64xf32>
    %163 = arith.negf %162 : vector<8x64xf32>
    %164 = math.exp %163 : vector<8x64xf32>
    %cst_86 = arith.constant 1.000000e+00 : f32
    %165 = vector.broadcast %cst_86 : f32 to vector<8x64xf32>
    %166 = arith.addf %165, %164 : vector<8x64xf32>
    %167 = arith.divf %165, %166 : vector<8x64xf32>
    %168 = vector.extract_strided_slice %161 {offsets = [0, 64], sizes = [8, 64], strides = [1, 1]} : vector<8x256xf32> to vector<8x64xf32>
    %169 = arith.negf %168 : vector<8x64xf32>
    %170 = math.exp %169 : vector<8x64xf32>
    %cst_87 = arith.constant 1.000000e+00 : f32
    %171 = vector.broadcast %cst_87 : f32 to vector<8x64xf32>
    %172 = arith.addf %171, %170 : vector<8x64xf32>
    %173 = arith.divf %171, %172 : vector<8x64xf32>
    %174 = vector.extract_strided_slice %161 {offsets = [0, 128], sizes = [8, 64], strides = [1, 1]} : vector<8x256xf32> to vector<8x64xf32>
    %175 = math.tanh %174 : vector<8x64xf32>
    %176 = vector.extract_strided_slice %161 {offsets = [0, 192], sizes = [8, 64], strides = [1, 1]} : vector<8x256xf32> to vector<8x64xf32>
    %177 = arith.negf %176 : vector<8x64xf32>
    %178 = math.exp %177 : vector<8x64xf32>
    %cst_88 = arith.constant 1.000000e+00 : f32
    %179 = vector.broadcast %cst_88 : f32 to vector<8x64xf32>
    %180 = arith.addf %179, %178 : vector<8x64xf32>
    %181 = arith.divf %179, %180 : vector<8x64xf32>
    %182 = arith.mulf %173, %126 : vector<8x64xf32>
    %183 = arith.mulf %167, %175 : vector<8x64xf32>
    %184 = arith.addf %182, %183 : vector<8x64xf32>
    %185 = math.tanh %184 : vector<8x64xf32>
    %186 = arith.mulf %181, %185 : vector<8x64xf32>
    %187 = vector.extract_strided_slice %69 {offsets = [16, 0], sizes = [8, 256], strides = [1, 1]} : vector<32x256xf32> to vector<8x256xf32>
    %cst_89 = arith.constant dense<0.000000e+00> : vector<8x256xf32>
    %188 = tpu.matmul %156, %60, %cst_89 {dimension_numbers = #tpu.dot_dimension_numbers<[1], [0], [0], [1], [0, 0, 1, 1], [], []>} : vector<8x64xf32>, vector<64x256xf32>, vector<8x256xf32> -> vector<8x256xf32>
    %189 = arith.addf %187, %188 : vector<8x256xf32>
    %190 = vector.extract_strided_slice %189 {offsets = [0, 0], sizes = [8, 64], strides = [1, 1]} : vector<8x256xf32> to vector<8x64xf32>
    %191 = arith.negf %190 : vector<8x64xf32>
    %192 = math.exp %191 : vector<8x64xf32>
    %cst_90 = arith.constant 1.000000e+00 : f32
    %193 = vector.broadcast %cst_90 : f32 to vector<8x64xf32>
    %194 = arith.addf %193, %192 : vector<8x64xf32>
    %195 = arith.divf %193, %194 : vector<8x64xf32>
    %196 = vector.extract_strided_slice %189 {offsets = [0, 64], sizes = [8, 64], strides = [1, 1]} : vector<8x256xf32> to vector<8x64xf32>
    %197 = arith.negf %196 : vector<8x64xf32>
    %198 = math.exp %197 : vector<8x64xf32>
    %cst_91 = arith.constant 1.000000e+00 : f32
    %199 = vector.broadcast %cst_91 : f32 to vector<8x64xf32>
    %200 = arith.addf %199, %198 : vector<8x64xf32>
    %201 = arith.divf %199, %200 : vector<8x64xf32>
    %202 = vector.extract_strided_slice %189 {offsets = [0, 128], sizes = [8, 64], strides = [1, 1]} : vector<8x256xf32> to vector<8x64xf32>
    %203 = math.tanh %202 : vector<8x64xf32>
    %204 = vector.extract_strided_slice %189 {offsets = [0, 192], sizes = [8, 64], strides = [1, 1]} : vector<8x256xf32> to vector<8x64xf32>
    %205 = arith.negf %204 : vector<8x64xf32>
    %206 = math.exp %205 : vector<8x64xf32>
    %cst_92 = arith.constant 1.000000e+00 : f32
    %207 = vector.broadcast %cst_92 : f32 to vector<8x64xf32>
    %208 = arith.addf %207, %206 : vector<8x64xf32>
    %209 = arith.divf %207, %208 : vector<8x64xf32>
    %210 = arith.mulf %201, %154 : vector<8x64xf32>
    %211 = arith.mulf %195, %203 : vector<8x64xf32>
    %212 = arith.addf %210, %211 : vector<8x64xf32>
    %213 = math.tanh %212 : vector<8x64xf32>
    %214 = arith.mulf %209, %213 : vector<8x64xf32>
    %cst_93 = arith.constant dense<0.000000e+00> : vector<8x256xf32>
    %215 = tpu.matmul %214, %61, %cst_93 {dimension_numbers = #tpu.dot_dimension_numbers<[1], [0], [0], [1], [0, 0, 1, 1], [], []>} : vector<8x64xf32>, vector<64x256xf32>, vector<8x256xf32> -> vector<8x256xf32>
    %cst_94 = arith.constant dense<0.000000e+00> : vector<8x256xf32>
    %216 = tpu.matmul %186, %62, %cst_94 {dimension_numbers = #tpu.dot_dimension_numbers<[1], [0], [0], [1], [0, 0, 1, 1], [], []>} : vector<8x64xf32>, vector<64x256xf32>, vector<8x256xf32> -> vector<8x256xf32>
    %217 = arith.addf %215, %216 : vector<8x256xf32>
    %218 = vector.broadcast %64 : vector<1x256xf32> to vector<8x256xf32>
    %219 = arith.addf %217, %218 : vector<8x256xf32>
    %220 = vector.extract_strided_slice %219 {offsets = [0, 0], sizes = [8, 64], strides = [1, 1]} : vector<8x256xf32> to vector<8x64xf32>
    %221 = arith.negf %220 : vector<8x64xf32>
    %222 = math.exp %221 : vector<8x64xf32>
    %cst_95 = arith.constant 1.000000e+00 : f32
    %223 = vector.broadcast %cst_95 : f32 to vector<8x64xf32>
    %224 = arith.addf %223, %222 : vector<8x64xf32>
    %225 = arith.divf %223, %224 : vector<8x64xf32>
    %226 = vector.extract_strided_slice %219 {offsets = [0, 64], sizes = [8, 64], strides = [1, 1]} : vector<8x256xf32> to vector<8x64xf32>
    %227 = arith.negf %226 : vector<8x64xf32>
    %228 = math.exp %227 : vector<8x64xf32>
    %cst_96 = arith.constant 1.000000e+00 : f32
    %229 = vector.broadcast %cst_96 : f32 to vector<8x64xf32>
    %230 = arith.addf %229, %228 : vector<8x64xf32>
    %231 = arith.divf %229, %230 : vector<8x64xf32>
    %232 = vector.extract_strided_slice %219 {offsets = [0, 128], sizes = [8, 64], strides = [1, 1]} : vector<8x256xf32> to vector<8x64xf32>
    %233 = math.tanh %232 : vector<8x64xf32>
    %234 = vector.extract_strided_slice %219 {offsets = [0, 192], sizes = [8, 64], strides = [1, 1]} : vector<8x256xf32> to vector<8x64xf32>
    %235 = arith.negf %234 : vector<8x64xf32>
    %236 = math.exp %235 : vector<8x64xf32>
    %cst_97 = arith.constant 1.000000e+00 : f32
    %237 = vector.broadcast %cst_97 : f32 to vector<8x64xf32>
    %238 = arith.addf %237, %236 : vector<8x64xf32>
    %239 = arith.divf %237, %238 : vector<8x64xf32>
    %240 = arith.mulf %231, %184 : vector<8x64xf32>
    %241 = arith.mulf %225, %233 : vector<8x64xf32>
    %242 = arith.addf %240, %241 : vector<8x64xf32>
    %243 = math.tanh %242 : vector<8x64xf32>
    %244 = arith.mulf %239, %243 : vector<8x64xf32>
    %245 = vector.extract_strided_slice %69 {offsets = [24, 0], sizes = [8, 256], strides = [1, 1]} : vector<32x256xf32> to vector<8x256xf32>
    %cst_98 = arith.constant dense<0.000000e+00> : vector<8x256xf32>
    %246 = tpu.matmul %214, %60, %cst_98 {dimension_numbers = #tpu.dot_dimension_numbers<[1], [0], [0], [1], [0, 0, 1, 1], [], []>} : vector<8x64xf32>, vector<64x256xf32>, vector<8x256xf32> -> vector<8x256xf32>
    %247 = arith.addf %245, %246 : vector<8x256xf32>
    %248 = vector.extract_strided_slice %247 {offsets = [0, 0], sizes = [8, 64], strides = [1, 1]} : vector<8x256xf32> to vector<8x64xf32>
    %249 = arith.negf %248 : vector<8x64xf32>
    %250 = math.exp %249 : vector<8x64xf32>
    %cst_99 = arith.constant 1.000000e+00 : f32
    %251 = vector.broadcast %cst_99 : f32 to vector<8x64xf32>
    %252 = arith.addf %251, %250 : vector<8x64xf32>
    %253 = arith.divf %251, %252 : vector<8x64xf32>
    %254 = vector.extract_strided_slice %247 {offsets = [0, 64], sizes = [8, 64], strides = [1, 1]} : vector<8x256xf32> to vector<8x64xf32>
    %255 = arith.negf %254 : vector<8x64xf32>
    %256 = math.exp %255 : vector<8x64xf32>
    %cst_100 = arith.constant 1.000000e+00 : f32
    %257 = vector.broadcast %cst_100 : f32 to vector<8x64xf32>
    %258 = arith.addf %257, %256 : vector<8x64xf32>
    %259 = arith.divf %257, %258 : vector<8x64xf32>
    %260 = vector.extract_strided_slice %247 {offsets = [0, 128], sizes = [8, 64], strides = [1, 1]} : vector<8x256xf32> to vector<8x64xf32>
    %261 = math.tanh %260 : vector<8x64xf32>
    %262 = vector.extract_strided_slice %247 {offsets = [0, 192], sizes = [8, 64], strides = [1, 1]} : vector<8x256xf32> to vector<8x64xf32>
    %263 = arith.negf %262 : vector<8x64xf32>
    %264 = math.exp %263 : vector<8x64xf32>
    %cst_101 = arith.constant 1.000000e+00 : f32
    %265 = vector.broadcast %cst_101 : f32 to vector<8x64xf32>
    %266 = arith.addf %265, %264 : vector<8x64xf32>
    %267 = arith.divf %265, %266 : vector<8x64xf32>
    %268 = arith.mulf %259, %212 : vector<8x64xf32>
    %269 = arith.mulf %253, %261 : vector<8x64xf32>
    %270 = arith.addf %268, %269 : vector<8x64xf32>
    %271 = math.tanh %270 : vector<8x64xf32>
    %272 = arith.mulf %267, %271 : vector<8x64xf32>
    %cst_102 = arith.constant dense<0.000000e+00> : vector<8x256xf32>
    %273 = tpu.matmul %272, %61, %cst_102 {dimension_numbers = #tpu.dot_dimension_numbers<[1], [0], [0], [1], [0, 0, 1, 1], [], []>} : vector<8x64xf32>, vector<64x256xf32>, vector<8x256xf32> -> vector<8x256xf32>
    %cst_103 = arith.constant dense<0.000000e+00> : vector<8x256xf32>
    %274 = tpu.matmul %244, %62, %cst_103 {dimension_numbers = #tpu.dot_dimension_numbers<[1], [0], [0], [1], [0, 0, 1, 1], [], []>} : vector<8x64xf32>, vector<64x256xf32>, vector<8x256xf32> -> vector<8x256xf32>
    %275 = arith.addf %273, %274 : vector<8x256xf32>
    %276 = vector.broadcast %64 : vector<1x256xf32> to vector<8x256xf32>
    %277 = arith.addf %275, %276 : vector<8x256xf32>
    %278 = vector.extract_strided_slice %277 {offsets = [0, 0], sizes = [8, 64], strides = [1, 1]} : vector<8x256xf32> to vector<8x64xf32>
    %279 = arith.negf %278 : vector<8x64xf32>
    %280 = math.exp %279 : vector<8x64xf32>
    %cst_104 = arith.constant 1.000000e+00 : f32
    %281 = vector.broadcast %cst_104 : f32 to vector<8x64xf32>
    %282 = arith.addf %281, %280 : vector<8x64xf32>
    %283 = arith.divf %281, %282 : vector<8x64xf32>
    %284 = vector.extract_strided_slice %277 {offsets = [0, 64], sizes = [8, 64], strides = [1, 1]} : vector<8x256xf32> to vector<8x64xf32>
    %285 = arith.negf %284 : vector<8x64xf32>
    %286 = math.exp %285 : vector<8x64xf32>
    %cst_105 = arith.constant 1.000000e+00 : f32
    %287 = vector.broadcast %cst_105 : f32 to vector<8x64xf32>
    %288 = arith.addf %287, %286 : vector<8x64xf32>
    %289 = arith.divf %287, %288 : vector<8x64xf32>
    %290 = vector.extract_strided_slice %277 {offsets = [0, 128], sizes = [8, 64], strides = [1, 1]} : vector<8x256xf32> to vector<8x64xf32>
    %291 = math.tanh %290 : vector<8x64xf32>
    %292 = vector.extract_strided_slice %277 {offsets = [0, 192], sizes = [8, 64], strides = [1, 1]} : vector<8x256xf32> to vector<8x64xf32>
    %293 = arith.negf %292 : vector<8x64xf32>
    %294 = math.exp %293 : vector<8x64xf32>
    %cst_106 = arith.constant 1.000000e+00 : f32
    %295 = vector.broadcast %cst_106 : f32 to vector<8x64xf32>
    %296 = arith.addf %295, %294 : vector<8x64xf32>
    %297 = arith.divf %295, %296 : vector<8x64xf32>
    %298 = arith.mulf %289, %242 : vector<8x64xf32>
    %299 = arith.mulf %283, %291 : vector<8x64xf32>
    %300 = arith.addf %298, %299 : vector<8x64xf32>
    %301 = math.tanh %300 : vector<8x64xf32>
    %302 = arith.mulf %297, %301 : vector<8x64xf32>
    %cst_107 = arith.constant dense<0.000000e+00> : vector<8x256xf32>
    %303 = tpu.matmul %302, %65, %cst_107 {dimension_numbers = #tpu.dot_dimension_numbers<[1], [0], [0], [1], [0, 0, 1, 1], [], []>} : vector<8x64xf32>, vector<64x256xf32>, vector<8x256xf32> -> vector<8x256xf32>
    %304 = vector.broadcast %66 : vector<1x256xf32> to vector<8x256xf32>
    %305 = arith.addf %303, %304 : vector<8x256xf32>
    %306 = vector.extract_strided_slice %305 {offsets = [0, 0], sizes = [8, 3], strides = [1, 1]} : vector<8x256xf32> to vector<8x3xf32>
    %c0_108 = arith.constant 0 : index
    %c0_109 = arith.constant 0 : index
    %307 = vector.load %arg11[%c0_108, %c0_109] : memref<8x3xf32, #tpu.memory_space<vmem>>, vector<8x3xf32>
    tpu.vector_store %arg11[%c0_108, %c0_109], %306 {strides = array<i32>} : memref<8x3xf32, #tpu.memory_space<vmem>>, vector<8x3xf32>,
    return
  }
  func.func @transform_0(%arg0: i32) -> (i32, i32) {
    %c0_i32 = arith.constant 0 : i32
    %c0_i32_0 = arith.constant 0 : i32
    return %arg0, %c0_i32 : i32, i32
  }
  func.func @transform_1(%arg0: i32) -> (i32, i32, i32) {
    %c0_i32 = arith.constant 0 : i32
    %c0_i32_0 = arith.constant 0 : i32
    %c0_i32_1 = arith.constant 0 : i32
    %c0_i32_2 = arith.constant 0 : i32
    return %c0_i32, %c0_i32_0, %c0_i32_1 : i32, i32, i32
  }
  func.func @transform_2(%arg0: i32) -> (i32, i32, i32) {
    %c0_i32 = arith.constant 0 : i32
    %c0_i32_0 = arith.constant 0 : i32
    %c0_i32_1 = arith.constant 0 : i32
    %c0_i32_2 = arith.constant 0 : i32
    return %c0_i32, %c0_i32_0, %c0_i32_1 : i32, i32, i32
  }
  func.func @transform_3(%arg0: i32) -> (i32, i32, i32) {
    %c0_i32 = arith.constant 0 : i32
    %c0_i32_0 = arith.constant 0 : i32
    %c0_i32_1 = arith.constant 0 : i32
    %c0_i32_2 = arith.constant 0 : i32
    return %c0_i32, %c0_i32_0, %c0_i32_1 : i32, i32, i32
  }
  func.func @transform_4(%arg0: i32) -> (i32, i32, i32) {
    %c0_i32 = arith.constant 0 : i32
    %c0_i32_0 = arith.constant 0 : i32
    %c0_i32_1 = arith.constant 0 : i32
    %c0_i32_2 = arith.constant 0 : i32
    return %c0_i32, %c0_i32_0, %c0_i32_1 : i32, i32, i32
  }
  func.func @transform_5(%arg0: i32) -> (i32, i32, i32) {
    %c0_i32 = arith.constant 0 : i32
    %c0_i32_0 = arith.constant 0 : i32
    %c0_i32_1 = arith.constant 0 : i32
    %c0_i32_2 = arith.constant 0 : i32
    return %c0_i32, %c0_i32_0, %c0_i32_1 : i32, i32, i32
  }
  func.func @transform_6(%arg0: i32) -> (i32, i32) {
    %c0_i32 = arith.constant 0 : i32
    %c0_i32_0 = arith.constant 0 : i32
    %c0_i32_1 = arith.constant 0 : i32
    return %c0_i32, %c0_i32_0 : i32, i32
  }
  func.func @transform_7(%arg0: i32) -> (i32, i32, i32) {
    %c0_i32 = arith.constant 0 : i32
    %c0_i32_0 = arith.constant 0 : i32
    %c0_i32_1 = arith.constant 0 : i32
    %c0_i32_2 = arith.constant 0 : i32
    return %c0_i32, %c0_i32_0, %c0_i32_1 : i32, i32, i32
  }
  func.func @transform_8(%arg0: i32) -> (i32, i32) {
    %c0_i32 = arith.constant 0 : i32
    %c0_i32_0 = arith.constant 0 : i32
    %c0_i32_1 = arith.constant 0 : i32
    return %c0_i32, %c0_i32_0 : i32, i32
  }
  func.func @transform_9(%arg0: i32) -> (i32, i32) {
    %c0_i32 = arith.constant 0 : i32
    %c0_i32_0 = arith.constant 0 : i32
    %c0_i32_1 = arith.constant 0 : i32
    return %c0_i32, %c0_i32_0 : i32, i32
  }
  func.func @transform_10(%arg0: i32) -> (i32, i32) {
    %c0_i32 = arith.constant 0 : i32
    %c0_i32_0 = arith.constant 0 : i32
    return %arg0, %c0_i32 : i32, i32
  }
}

</mosaic_0001>

<bundles_post_ra>
// kernel: cnn_lstm_forward.1
= control target key start
LH: loop header
LB: loop body
LE: loop exit
PB: predicated region body
PF: predicated region fallthrough
CT: control target
= control target key end

     0   :  { %s4886_s13 = smov 0   ;;  %s6081_s0 = inlined_call_operand.vmem [shape: f32[256,4], index: 0, kind: input, shape index: {}]   ;;  %s6082_s1 = inlined_call_operand.vmem [shape: f32[2,128,128], index: 1, kind: input, shape index: {}]   ;;  %s6083_s2 = inlined_call_operand.vmem [shape: f32[2,64,128], index: 2, kind: input, shape index: {}]   ;;  %s6084_s3 = inlined_call_operand.vmem [shape: f32[2,64,64], index: 3, kind: input, shape index: {}]   ;;  %s6085_s4 = inlined_call_operand.vmem [shape: f32[2,32,64], index: 4, kind: input, shape index: {}]   ;;  %s6086_s5 = inlined_call_operand.vmem [shape: f32[3,4,64], index: 5, kind: input, shape index: {}]   ;;  %s6087_s6 = inlined_call_operand.vmem [shape: f32[1,64], index: 6, kind: input, shape index: {}]   ;;  %s6088_s7 = inlined_call_operand.vmem [shape: f32[3,64,32], index: 7, kind: input, shape index: {}]   ;;  %s6089_s8 = inlined_call_operand.vmem [shape: f32[1,32], index: 8, kind: input, shape index: {}]   ;;  %s6090_s9 = inlined_call_operand.vmem [shape: f32[312,256], index: 9, kind: input, shape index: {}]   ;;  %s6091_s10 = inlined_call_operand.vmem [shape: f32[16,3], index: 10, kind: output, shape index: {}]  }
   0x1 LB: > { %s4892_s14 = sadd.s32 4294967295, %s4827_s13   ;;  %p3791_p0 = scmp.ge.s32.totalorder %s4827_s13, 1  ;;  %s4827_s13 = sphi %s4886_s13, %s20_s13  }
   0x2   : > { %p313_p1 = scmp.lt.s32.totalorder %s4827_s13, 3 }
   0x4   : > { %p314_p2 = pnand %p3791_p0, %p313_p1 }
   0x6   : > { %317 = sbr.rel (%p314_p2) target bundleno = 4032 (0xfc0), region = 60 }
   0xb   : > { %v376_v0 = vld [vmem:[%s6086_s5] sm:$0xf]  ;;  %vm426_vm0 = vcmask 1043456   ;;  %s3792_s17 = sshll.u32 %s4892_s14, 4  ;;  %v3830_v1 = vld [vmem:[%s6086_s5 + $0x8] sm:$0xf] }
   0xc   : > { %4253 = vmatprep.subr.msk.mxu0 %vm426_vm0, %v376_v0  ;;  %p351_p3 = scmp.lt.s32.totalorder %s3792_s17, 31  ;;  %vm377_vm1 = vcmask 31744   ;;  %v3812_v18 = vld [vmem:[%s6086_s5 + $0x4] sm:$0xf]  ;;  %v876_v51 = vld [vmem:[%s6082_s1 + $0x8] sm:$0xff]  ;;  %v877_v52 = vld [vmem:[%s6082_s1 + $0x10] sm:$0xff] }
   0xd   : > { %4254 = vmatpush3.msk.msra.mxu0 %vm426_vm0, %v376_v0  ;;  %4279 = vmatprep.subr.msk.mxu1 %vm426_vm0, %v3812_v18  ;;  %v875_v19 = vld [vmem:[%s6082_s1] sm:$0xff]  ;;  %v878_v55 = vld [vmem:[%s6082_s1 + $0x18] sm:$0xff]  ;;  %v880_v57 = vld [vmem:[%s6082_s1 + $0x28] sm:$0xff]  ;;  %vm1496_vm2 = vcmask 523264   ;;  %vm2456_vm3 = vcmask 261120   ;;  %p356_p4 = scmp.lt.s32.totalorder %s4892_s14, 1 }
   0xe   : > { %s6144_s17 = smov (!%p351_p3, %s3792_s17), 31  ;;  %4305 = vmatprep.subr.msk.mxu0 %vm426_vm0, %v3830_v1  ;;  %4280 = vmatpush3.msk.msra.mxu1 %vm426_vm0, %v3812_v18  ;;  %v3848_v20 = vld [vmem:[%s6082_s1 + $0x80] sm:$0xff]  ;;  %v881_v58 = vld [vmem:[%s6082_s1 + $0x30] sm:$0xff]  ;;  %v882_v59 = vld [vmem:[%s6082_s1 + $0x38] sm:$0xff]  ;;  %vm3732_vm4 = vcmask 23552  }
   0xf   : > { %s3793_s20 = sshll.u32 %s6144_s17, 3  ;;  %v879_v56 = vld [vmem:[%s6082_s1 + $0x20] sm:$0xff]  ;;  %v884_v61 = vld [vmem:[%s6082_s1 + $0x48] sm:$0xff]  ;;  %v885_v62 = vld [vmem:[%s6082_s1 + $0x50] sm:$0xff]  ;;  %s6146_s14 = smov (!%p356_p4, %s4892_s14), 1 }
  0x10   : > { %s4909_s23 = scalar_lea.vmem %s6081_s0, %s3793_s20  ;;  %v883_v60 = vld [vmem:[%s6082_s1 + $0x40] sm:$0xff]  ;;  %v886_v63 = vld [vmem:[%s6082_s1 + $0x58] sm:$0xff]  ;;  %s4830_s20 = smov 64  }
  0x11   : > { %v360_v2 = vld [vmem:[%s4909_s23] sm:$0xff]  ;;  %v361_v3 = vld [vmem:[%s4909_s23 + $0x8] sm:$0xff]  ;;  %v362_v4 = vld [vmem:[%s4909_s23 + $0x10] sm:$0xff]  ;;  %s3794_s18 = sshll.u32 %s6146_s14, 3 }
  0x12   : > { %4255 = vmatprep.mubr.msk.f32.mxu0 %vm377_vm1, %v360_v2  ;;  %4281 = vmatprep.mubr.msk.f32.mxu1 %vm377_vm1, %v360_v2  ;;  %v363_v5 = vld [vmem:[%s4909_s23 + $0x18] sm:$0xff]  ;;  %v364_v6 = vld [vmem:[%s4909_s23 + $0x20] sm:$0xff]  ;;  %v365_v7 = vld [vmem:[%s4909_s23 + $0x28] sm:$0xff]  ;;  %s359_s22 = scalar_lea.vmem %s6091_s10, %s3794_s18 }
  0x13   : > { %4256 = vmatmul.mubr.msk.f32.vlgmr.msra.gmra.mxu0 %vm377_vm1, %v361_v3  ;;  %v366_v8 = vld [vmem:[%s4909_s23 + $0x30] sm:$0xff]  ;;  %v367_v9 = vld [vmem:[%s4909_s23 + $0x38] sm:$0xff]  ;;  %v368_v10 = vld [vmem:[%s4909_s23 + $0x40] sm:$0xff]  ;;  %4282 = vmatmul.mubr.msk.f32.vlgmr.msra.gmra.mxu1 %vm377_vm1, %v361_v3 }
  0x14   : > { %4306 = vmatpush3.msk.msra.mxu0 %vm426_vm0, %v3830_v1  ;;  %4258 = vmatprep.mubr.msk.f32.mxu0 %vm377_vm1, %v362_v4  ;;  %v369_v11 = vld [vmem:[%s4909_s23 + $0x48] sm:$0xff]  ;;  %v370_v12 = vld [vmem:[%s4909_s23 + $0x50] sm:$0xff]  ;;  %v371_v13 = vld [vmem:[%s4909_s23 + $0x58] sm:$0xff] }
  0x15   : > { %v372_v14 = vld [vmem:[%s4909_s23 + $0x60] sm:$0xff]  ;;  %v373_v15 = vld [vmem:[%s4909_s23 + $0x68] sm:$0xff]  ;;  %v374_v16 = vld [vmem:[%s4909_s23 + $0x70] sm:$0xff]  ;;  %4284 = vmatprep.mubr.msk.f32.mxu1 %vm377_vm1, %v362_v4 }
  0x16   : > { %v375_v17 = vld [vmem:[%s4909_s23 + $0x78] sm:$0xff]  ;;  %v887_v0 = vld [vmem:[%s6082_s1 + $0x60] sm:$0xff]  ;;  %v888_v1 = vld [vmem:[%s6082_s1 + $0x68] sm:$0xff] }
  0x17   : > { %4259 = vmatmul.mubr.msk.f32.gmra.mxu0 %vm377_vm1, %v363_v5  ;;  %4285 = vmatmul.mubr.msk.f32.gmra.mxu1 %vm377_vm1, %v363_v5  ;;  %v3863_v18 = vld [vmem:[%s6082_s1 + $0xf8] sm:$0xff] }
  0x18   : > { %4261 = vmatprep.mubr.msk.f32.mxu0 %vm377_vm1, %v364_v6  ;;  %4287 = vmatprep.mubr.msk.f32.mxu1 %vm377_vm1, %v364_v6 }
  0x1b   : > { %4262 = vmatmul.mubr.msk.f32.gmra.mxu0 %vm377_vm1, %v365_v7  ;;  %4288 = vmatmul.mubr.msk.f32.gmra.mxu1 %vm377_vm1, %v365_v7 }
  0x1c   : > { %4264 = vmatprep.mubr.msk.f32.mxu0 %vm377_vm1, %v366_v8  ;;  %4290 = vmatprep.mubr.msk.f32.mxu1 %vm377_vm1, %v366_v8 }
  0x1f   : > { %4265 = vmatmul.mubr.msk.f32.gmra.mxu0 %vm377_vm1, %v367_v9  ;;  %4291 = vmatmul.mubr.msk.f32.gmra.mxu1 %vm377_vm1, %v367_v9 }
  0x20   : > { %4267 = vmatprep.mubr.msk.f32.mxu0 %vm377_vm1, %v368_v10  ;;  %4293 = vmatprep.mubr.msk.f32.mxu1 %vm377_vm1, %v368_v10 }
  0x23   : > { %4268 = vmatmul.mubr.msk.f32.gmra.mxu0 %vm377_vm1, %v369_v11  ;;  %4294 = vmatmul.mubr.msk.f32.gmra.mxu1 %vm377_vm1, %v369_v11 }
  0x24   : > { %4270 = vmatprep.mubr.msk.f32.mxu0 %vm377_vm1, %v370_v12  ;;  %4296 = vmatprep.mubr.msk.f32.mxu1 %vm377_vm1, %v370_v12 }
  0x27   : > { %4271 = vmatmul.mubr.msk.f32.gmra.mxu0 %vm377_vm1, %v371_v13  ;;  %4297 = vmatmul.mubr.msk.f32.gmra.mxu1 %vm377_vm1, %v371_v13 }
  0x28   : > { %4273 = vmatprep.mubr.msk.f32.mxu0 %vm377_vm1, %v372_v14  ;;  %4299 = vmatprep.mubr.msk.f32.mxu1 %vm377_vm1, %v372_v14 }
  0x2b   : > { %4274 = vmatmul.mubr.msk.f32.gmra.mxu0 %vm377_vm1, %v373_v15  ;;  %4300 = vmatmul.mubr.msk.f32.gmra.mxu1 %vm377_vm1, %v373_v15 }
  0x2c   : > { %4276 = vmatprep.mubr.msk.f32.mxu0 %vm377_vm1, %v374_v16  ;;  %4302 = vmatprep.mubr.msk.f32.mxu1 %vm377_vm1, %v374_v16 }
  0x2f   : > { %4277 = vmatmul.mubr.msk.f32.gmra.mxu0 %vm377_vm1, %v375_v17  ;;  %4303 = vmatmul.mubr.msk.f32.gmra.mxu1 %vm377_vm1, %v375_v17 }
  0x30   : > { %4307 = vmatprep.mubr.msk.f32.mxu0 %vm377_vm1, %v360_v2  ;;  %4363 = vmatprep.mubr.f32.mxu1 %v875_v19  ;;  %v889_v2 = vld [vmem:[%s6082_s1 + $0x70] sm:$0xff] }
  0x33   : > { %4308 = vmatmul.mubr.msk.f32.vlgmr.msra.gmra.mxu0 %vm377_vm1, %v361_v3  ;;  %v890_v3 = vld [vmem:[%s6082_s1 + $0x78] sm:$0xff] }
  0x34   : > { %4310 = vmatprep.mubr.msk.f32.mxu0 %vm377_vm1, %v362_v4  ;;  %v3849_v4 = vld [vmem:[%s6082_s1 + $0x88] sm:$0xff] }
  0x37   : > { %4311 = vmatmul.mubr.msk.f32.gmra.mxu0 %vm377_vm1, %v363_v5  ;;  %v3850_v5 = vld [vmem:[%s6082_s1 + $0x90] sm:$0xff] }
  0x38   : > { %4313 = vmatprep.mubr.msk.f32.mxu0 %vm377_vm1, %v364_v6  ;;  %v3851_v6 = vld [vmem:[%s6082_s1 + $0x98] sm:$0xff] }
  0x3b   : > { %4314 = vmatmul.mubr.msk.f32.gmra.mxu0 %vm377_vm1, %v365_v7  ;;  %v3852_v7 = vld [vmem:[%s6082_s1 + $0xa0] sm:$0xff] }
  0x3c   : > { %4316 = vmatprep.mubr.msk.f32.mxu0 %vm377_vm1, %v366_v8  ;;  %v3853_v8 = vld [vmem:[%s6082_s1 + $0xa8] sm:$0xff] }
  0x3f   : > { %4317 = vmatmul.mubr.msk.f32.gmra.mxu0 %vm377_vm1, %v367_v9  ;;  %v3854_v9 = vld [vmem:[%s6082_s1 + $0xb0] sm:$0xff] }
  0x40   : > { %4319 = vmatprep.mubr.msk.f32.mxu0 %vm377_vm1, %v368_v10  ;;  %v3855_v10 = vld [vmem:[%s6082_s1 + $0xb8] sm:$0xff] }
  0x43   : > { %4320 = vmatmul.mubr.msk.f32.gmra.mxu0 %vm377_vm1, %v369_v11  ;;  %v3856_v11 = vld [vmem:[%s6082_s1 + $0xc0] sm:$0xff] }
  0x44   : > { %4322 = vmatprep.mubr.msk.f32.mxu0 %vm377_vm1, %v370_v12  ;;  %v3857_v12 = vld [vmem:[%s6082_s1 + $0xc8] sm:$0xff] }
  0x47   : > { %4323 = vmatmul.mubr.msk.f32.gmra.mxu0 %vm377_vm1, %v371_v13  ;;  %v3858_v13 = vld [vmem:[%s6082_s1 + $0xd0] sm:$0xff] }
  0x48   : > { %4325 = vmatprep.mubr.msk.f32.mxu0 %vm377_vm1, %v372_v14  ;;  %v3859_v14 = vld [vmem:[%s6082_s1 + $0xd8] sm:$0xff] }
  0x4b   : > { %4326 = vmatmul.mubr.msk.f32.gmra.mxu0 %vm377_vm1, %v373_v15  ;;  %v3860_v15 = vld [vmem:[%s6082_s1 + $0xe0] sm:$0xff] }
  0x4c   : > { %4328 = vmatprep.mubr.msk.f32.mxu0 %vm377_vm1, %v374_v16  ;;  %v3861_v16 = vld [vmem:[%s6082_s1 + $0xe8] sm:$0xff] }
  0x4f   : > { %4329 = vmatmul.mubr.msk.f32.gmra.mxu0 %vm377_vm1, %v375_v17  ;;  %v3862_v17 = vld [vmem:[%s6082_s1 + $0xf0] sm:$0xff] }
  0x50   : > { %4419 = vmatprep.mubr.f32.mxu0 %v3848_v20 }
  0xd3   : > { %v4257_v21 = vpop.f32.mrf.mxu0  ;;  %v5105_v19 = vpop.f32.mrf.mxu1 }
  0xd5   : > { %v496_v22 = vpop.f32.mrf.mxu0  ;;  %v5107_v20 = vpop.f32.mrf.mxu1 }
  0xd7   : > { %v4260_v23 = vpop.f32.mrf.mxu0 }
  0xd9   : > { %v506_v24 = vpop.f32.mrf.mxu0 }
  0xdb   : > { %v4263_v25 = vpop.f32.mrf.mxu0 }
  0xdd   : > { %v516_v26 = vpop.f32.mrf.mxu0 }
  0xdf   : > { %v4266_v27 = vpop.f32.mrf.mxu0 }
  0xe1   : > { %v526_v28 = vpop.f32.mrf.mxu0 }
  0xe3   : > { %v4269_v29 = vpop.f32.mrf.mxu0 }
  0xe5   : > { %v536_v30 = vpop.f32.mrf.mxu0 }
  0xe7   : > { %v4272_v31 = vpop.f32.mrf.mxu0 }
  0xe9   : > { %v546_v32 = vpop.f32.mrf.mxu0 }
  0xeb   : > { %v4275_v33 = vpop.f32.mrf.mxu0 }
  0xed   : > { %v556_v34 = vpop.f32.mrf.mxu0 }
  0xef   : > { %v4278_v35 = vpop.f32.mrf.mxu0 }
  0xf0   : > { %4331 = vmatprep.subr.mxu1 %v4278_v35 }
  0xf1   : > { %v566_v36 = vpop.f32.mrf.mxu0  ;;  %4332 = vmatpush3.msra.mxu1 %v4278_v35 }
  0xf2   : > { %4333 = vmatprep.subr.mxu1 %v566_v36 }
  0xf3   : > { %v4987_v37 = vpop.f32.mrf.mxu0  ;;  %4334 = vmatpush3.msra.mxu1 %v566_v36 }
  0xf4   : > { %4335 = vmatprep.subr.mxu1 %v4275_v33 }
  0xf5   : > { %v4989_v38 = vpop.f32.mrf.mxu0  ;;  %4336 = vmatpush3.msra.mxu1 %v4275_v33 }
  0xf6   : > { %4337 = vmatprep.subr.mxu1 %v556_v34 }
  0xf7   : > { %v4991_v39 = vpop.f32.mrf.mxu0  ;;  %4338 = vmatpush3.msra.mxu1 %v556_v34 }
  0xf8   : > { %4339 = vmatprep.subr.mxu1 %v4272_v31 }
  0xf9   : > { %v4993_v40 = vpop.f32.mrf.mxu0  ;;  %4340 = vmatpush3.msra.mxu1 %v4272_v31 }
  0xfa   : > { %4341 = vmatprep.subr.mxu1 %v546_v32 }
  0xfb   : > { %v4995_v41 = vpop.f32.mrf.mxu0  ;;  %4342 = vmatpush3.msra.mxu1 %v546_v32 }
  0xfc   : > { %4343 = vmatprep.subr.mxu1 %v4269_v29 }
  0xfd   : > { %v4997_v42 = vpop.f32.mrf.mxu0  ;;  %4344 = vmatpush3.msra.mxu1 %v4269_v29  ;;  %v3865_v29 = vld [vmem:[%s6083_s2 + $0x40] sm:$0xff] }
  0xfe   : > { %4345 = vmatprep.subr.mxu1 %v536_v30 }
  0xff   : > { %v4318_v43 = vpop.f32.mrf.mxu0  ;;  %4346 = vmatpush3.msra.mxu1 %v536_v30 }
 0x100   : > { %4347 = vmatprep.subr.mxu1 %v4266_v27 }
 0x101   : > { %v4999_v44 = vpop.f32.mrf.mxu0  ;;  %4348 = vmatpush3.msra.mxu1 %v4266_v27 }
 0x102   : > { %4349 = vmatprep.subr.mxu1 %v526_v28 }
 0x103   : > { %v4321_v45 = vpop.f32.mrf.mxu0  ;;  %4350 = vmatpush3.msra.mxu1 %v526_v28  ;;  %v1253_v28 = vld [vmem:[%s6083_s2] sm:$0xff] }
 0x104   : > { %4351 = vmatprep.subr.mxu1 %v4263_v25 }
 0x105   : > { %v836_v46 = vpop.f32.mrf.mxu0  ;;  %4352 = vmatpush3.msra.mxu1 %v4263_v25 }
 0x106   : > { %4353 = vmatprep.subr.mxu1 %v516_v26 }
 0x107   : > { %v4324_v47 = vpop.f32.mrf.mxu0  ;;  %4354 = vmatpush3.msra.mxu1 %v516_v26 }
 0x108   : > { %4355 = vmatprep.subr.mxu1 %v4260_v23 }
 0x109   : > { %v846_v48 = vpop.f32.mrf.mxu0  ;;  %4356 = vmatpush3.msra.mxu1 %v4260_v23 }
 0x10a   : > { %4357 = vmatprep.subr.mxu1 %v506_v24 }
 0x10b   : > { %v4327_v49 = vpop.f32.mrf.mxu0  ;;  %4358 = vmatpush3.msra.mxu1 %v506_v24 }
 0x10c   : > { %4359 = vmatprep.subr.mxu1 %v4257_v21 }
 0x10d   : > { %v856_v50 = vpop.f32.mrf.mxu0  ;;  %4360 = vmatpush3.msra.mxu1 %v4257_v21  ;;  %v5109_v21 = vpop.f32.mrf.mxu1 }
 0x10e   : > { %4361 = vmatprep.subr.mxu1 %v496_v22 }
 0x10f   : > { %v4330_v53 = vpop.f32.mrf.mxu0  ;;  %4362 = vmatpush3.msra.mxu1 %v496_v22  ;;  %v5111_v22 = vpop.f32.mrf.mxu1 }
 0x110   : > { %4364 = vmatmul.mubr.f32.vlgmr.msra.gmra.mxu1 %v876_v51  ;;  %4387 = vmatprep.subr.mxu0 %v4330_v53 }
 0x111   : > { %v866_v54 = vpop.f32.mrf.mxu0  ;;  %4388 = vmatpush3.msra.mxu0 %v4330_v53  ;;  %4366 = vmatprep.mubr.f32.mxu1 %v877_v52  ;;  %v5113_v23 = vpop.f32.mrf.mxu1 }
 0x112   : > { %4389 = vmatprep.subr.mxu0 %v866_v54 }
 0x113   : > { %4390 = vmatpush3.msra.mxu0 %v866_v54  ;;  %v5115_v24 = vpop.f32.mrf.mxu1 }
 0x114   : > { %4367 = vmatmul.mubr.f32.gmra.mxu1 %v878_v55  ;;  %4391 = vmatprep.subr.mxu0 %v4327_v49 }
 0x115   : > { %4392 = vmatpush3.msra.mxu0 %v4327_v49  ;;  %4369 = vmatprep.mubr.f32.mxu1 %v879_v56  ;;  %v5117_v25 = vpop.f32.mrf.mxu1 }
 0x116   : > { %4393 = vmatprep.subr.mxu0 %v856_v50 }
 0x117   : > { %4394 = vmatpush3.msra.mxu0 %v856_v50  ;;  %v5119_v26 = vpop.f32.mrf.mxu1 }
 0x118   : > { %4370 = vmatmul.mubr.f32.gmra.mxu1 %v880_v57  ;;  %4395 = vmatprep.subr.mxu0 %v4324_v47 }
 0x119   : > { %4396 = vmatpush3.msra.mxu0 %v4324_v47  ;;  %4372 = vmatprep.mubr.f32.mxu1 %v881_v58  ;;  %v4295_v27 = vpop.f32.mrf.mxu1 }
 0x11a   : > { %4397 = vmatprep.subr.mxu0 %v846_v48 }
 0x11b   : > { %4398 = vmatpush3.msra.mxu0 %v846_v48  ;;  %v5127_v30 = vpop.f32.mrf.mxu1 }
 0x11c   : > { %4373 = vmatmul.mubr.f32.gmra.mxu1 %v882_v59  ;;  %4399 = vmatprep.subr.mxu0 %v4321_v45 }
 0x11d   : > { %4400 = vmatpush3.msra.mxu0 %v4321_v45  ;;  %4375 = vmatprep.mubr.f32.mxu1 %v883_v60  ;;  %v4298_v31 = vpop.f32.mrf.mxu1 }
 0x11e   : > { %4401 = vmatprep.subr.mxu0 %v836_v46 }
 0x11f   : > { %4402 = vmatpush3.msra.mxu0 %v836_v46  ;;  %v696_v32 = vpop.f32.mrf.mxu1 }
 0x120   : > { %4376 = vmatmul.mubr.f32.gmra.mxu1 %v884_v61  ;;  %4403 = vmatprep.subr.mxu0 %v4318_v43 }
 0x121   : > { %4404 = vmatpush3.msra.mxu0 %v4318_v43  ;;  %4378 = vmatprep.mubr.f32.mxu1 %v885_v62  ;;  %v4301_v33 = vpop.f32.mrf.mxu1 }
 0x122   : > { %4405 = vmatprep.subr.mxu0 %v4999_v44 }
 0x123   : > { %4406 = vmatpush3.msra.mxu0 %v4999_v44  ;;  %v706_v34 = vpop.f32.mrf.mxu1 }
 0x124   : > { %4379 = vmatmul.mubr.f32.gmra.mxu1 %v886_v63  ;;  %4407 = vmatprep.subr.mxu0 %v4995_v41 }
 0x125   : > { %4408 = vmatpush3.msra.mxu0 %v4995_v41  ;;  %4381 = vmatprep.mubr.f32.mxu1 %v887_v0  ;;  %v4304_v35 = vpop.f32.mrf.mxu1 }
 0x126   : > { %4409 = vmatprep.subr.mxu0 %v4997_v42 }
 0x127   : > { %4410 = vmatpush3.msra.mxu0 %v4997_v42  ;;  %v716_v36 = vpop.f32.mrf.mxu1 }
 0x128   : > { %4382 = vmatmul.mubr.f32.gmra.mxu1 %v888_v1  ;;  %4411 = vmatprep.subr.mxu0 %v4991_v39 }
 0x129   : > { %4412 = vmatpush3.msra.mxu0 %v4991_v39  ;;  %4384 = vmatprep.mubr.f32.mxu1 %v889_v2 }
 0x12a   : > { %4413 = vmatprep.subr.mxu0 %v4993_v40 }
 0x12b   : > { %4414 = vmatpush3.msra.mxu0 %v4993_v40 }
 0x12c   : > { %4385 = vmatmul.mubr.f32.gmra.mxu1 %v890_v3  ;;  %4415 = vmatprep.subr.mxu0 %v4987_v37 }
 0x12d   : > { %4416 = vmatpush3.msra.mxu0 %v4987_v37  ;;  %4475 = vmatprep.mubr.f32.mxu1 %v1253_v28 }
 0x12e   : > { %4417 = vmatprep.subr.mxu0 %v4989_v38 }
 0x12f   : > { %4418 = vmatpush3.msra.mxu0 %v4989_v38 }
 0x130   : > { %4420 = vmatmul.mubr.f32.vlgmr.msra.gmra.mxu0 %v3849_v4 }
 0x131   : > { %4422 = vmatprep.mubr.f32.mxu0 %v3850_v5 }
 0x134   : > { %4423 = vmatmul.mubr.f32.gmra.mxu0 %v3851_v6 }
 0x135   : > { %4425 = vmatprep.mubr.f32.mxu0 %v3852_v7 }
 0x138   : > { %4426 = vmatmul.mubr.f32.gmra.mxu0 %v3853_v8 }
 0x139   : > { %4428 = vmatprep.mubr.f32.mxu0 %v3854_v9 }
 0x13c   : > { %4429 = vmatmul.mubr.f32.gmra.mxu0 %v3855_v10  ;;  %v5158_v10 = vld [vmem:[%s6087_s6] ss:$0 sm:$0xff] }
 0x13d   : > { %4431 = vmatprep.mubr.f32.mxu0 %v3856_v11 }
 0x140   : > { %4432 = vmatmul.mubr.f32.gmra.mxu0 %v3857_v12 }
 0x141   : > { %4434 = vmatprep.mubr.f32.mxu0 %v3858_v13 }
 0x144   : > { %4435 = vmatmul.mubr.f32.gmra.mxu0 %v3859_v14 }
 0x145   : > { %4437 = vmatprep.mubr.f32.mxu0 %v3860_v15 }
 0x148   : > { %4438 = vmatmul.mubr.f32.gmra.mxu0 %v3861_v16 }
 0x149   : > { %4440 = vmatprep.mubr.f32.mxu0 %v3862_v17 }
 0x14c   : > { %4441 = vmatmul.mubr.f32.gmra.mxu0 %v3863_v18 }
 0x14d   : > { %4519 = vmatprep.mubr.f32.mxu0 %v3865_v29 }
 0x1d0   : > { %v5129_v37 = vpop.f32.mrf.mxu1 }
 0x1d2   : > { %v5131_v38 = vpop.f32.mrf.mxu1 }
 0x1d4   : > { %v5133_v39 = vpop.f32.mrf.mxu1 }
 0x1d6   : > { %v5135_v40 = vpop.f32.mrf.mxu1 }
 0x1d8   : > { %v5137_v41 = vpop.f32.mrf.mxu1 }
 0x1da   : > { %v5139_v42 = vpop.f32.mrf.mxu1 }
 0x1dc   : > { %v4374_v43 = vpop.f32.mrf.mxu1 }
 0x1de   : > { %v5141_v44 = vpop.f32.mrf.mxu1 }
 0x1e0   : > { %v4377_v45 = vpop.f32.mrf.mxu1 }
 0x1e2   : > { %v997_v47 = vpop.f32.mrf.mxu1 }
 0x1e4   : > { %v4380_v50 = vpop.f32.mrf.mxu1 }
 0x1e5   : > { %v1013_v12 = vadd.f32 %v4380_v50, %v4298_v31  ;;  %v998_v31 = vadd.f32 %v997_v47, %v5127_v30  ;;  %v988_v30 = vadd.f32 %v5141_v44, %v5119_v26  ;;  %v978_v26 = vadd.f32 %v5139_v42, %v5115_v24 }
 0x1e6   : > { %v1007_v53 = vpop.f32.mrf.mxu1  ;;  %v968_v24 = vadd.f32 %v5135_v40, %v5111_v22  ;;  %v958_v22 = vadd.f32 %v5131_v38, %v5107_v20 }
 0x1e7   : > { %v1008_v16 = vadd.f32 %v1007_v53, %v696_v32 }
 0x1e8   : > { %v4383_v56 = vpop.f32.mrf.mxu1 }
 0x1e9   : > { %v1023_v3 = vadd.f32 %v4383_v56, %v4301_v33  ;;  %v1003_v33 = vadd.f32 %v4377_v45, %v4295_v27  ;;  %v993_v27 = vadd.f32 %v4374_v43, %v5117_v25  ;;  %v983_v25 = vadd.f32 %v5137_v41, %v5113_v23 }
 0x1ea   : > { %v1017_v59 = vpop.f32.mrf.mxu1  ;;  %v973_v23 = vadd.f32 %v5133_v39, %v5109_v21  ;;  %v963_v21 = vadd.f32 %v5129_v37, %v5105_v19 }
 0x1eb   : > { %v1018_v6 = vadd.f32 %v1017_v59, %v706_v34 }
 0x1ec   : > { %v4386_v62 = vpop.f32.mrf.mxu1 }
 0x1ed   : > { %v1033_v4 = vadd.f32 %v4386_v62, %v4304_v35 }
 0x1ee   : > { %v1027_v1 = vpop.f32.mrf.mxu1 }
 0x1ef   : > { %v1028_v7 = vadd.f32 %v1027_v1, %v716_v36 }
 0x1f0   : > { %v5143_v46 = vpop.f32.mrf.mxu0 }
 0x1f1   : > { %v1199_v40 = vadd.f32 %v5143_v46, %v963_v21 }
 0x1f2   : > { %v5145_v48 = vpop.f32.mrf.mxu0 }
 0x1f3   : > { %v1198_v19 = vadd.f32 %v5145_v48, %v958_v22  ;;  %v1222_v20 = vadd.f32 %v5158_v10, %v1199_v40 }
 0x1f4   : > { %v5147_v49 = vpop.f32.mrf.mxu0 }
 0x1f5   : > { %v1201_v42 = vadd.f32 %v5147_v49, %v973_v23  ;;  %v1221_v46 = vadd.f32 %v5158_v10, %v1198_v19  ;;  %v1238_v48 = vmax.f32 %v1222_v20, 0.0  ;;  %v3887_v23 = vld [vmem:[%s6088_s7 + $0x70] sm:$0xff] }
 0x1f6   : > { %v5149_v51 = vpop.f32.mrf.mxu0 }
 0x1f7   : > { %v1200_v39 = vadd.f32 %v5149_v51, %v968_v24  ;;  %v1224_v49 = vadd.f32 %v5158_v10, %v1201_v42 }
 0x1f8   : > { %v5151_v52 = vpop.f32.mrf.mxu0 }
 0x1f9   : > { %v1203_v44 = vadd.f32 %v5151_v52, %v983_v25  ;;  %v1223_v37 = vadd.f32 %v5158_v10, %v1200_v39  ;;  %v1240_v38 = vmax.f32 %v1224_v49, 0.0  ;;  %v3884_v49 = vld [vmem:[%s6088_s7 + $0x58] sm:$0xff] }
 0x1fa   : > { %v5153_v54 = vpop.f32.mrf.mxu0 }
 0x1fb   : > { %v1202_v41 = vadd.f32 %v5153_v54, %v978_v26  ;;  %v1226_v52 = vadd.f32 %v5158_v10, %v1203_v44 }
 0x1fc   : > { %v4430_v55 = vpop.f32.mrf.mxu0 }
 0x1fd   : > { %v1205_v47 = vadd.f32 %v4430_v55, %v993_v27  ;;  %v1225_v54 = vadd.f32 %v5158_v10, %v1202_v41  ;;  %v3900_v27 = vld [vmem:[%s6088_s7 + $0x98] sm:$0xff] }
 0x1fe   : > { %v1149_v57 = vpop.f32.mrf.mxu0 }
 0x1ff   : > { %v1204_v43 = vadd.f32 %v1149_v57, %v988_v30  ;;  %v1228_v55 = vadd.f32 %v5158_v10, %v1205_v47  ;;  %v1241_v51 = vmax.f32 %v1225_v54, 0.0  ;;  %v3898_v30 = vld [vmem:[%s6088_s7 + $0x88] sm:$0xff]  ;;  %v1488_v47 = vld [vmem:[%s6088_s7] sm:$0xff] }
 0x200   : > { %v4433_v58 = vpop.f32.mrf.mxu0  ;;  %v3885_v54 = vld [vmem:[%s6088_s7 + $0x60] sm:$0xff] }
 0x201   : > { %v1207_v50 = vadd.f32 %v4433_v58, %v1003_v33  ;;  %v1227_v57 = vadd.f32 %v5158_v10, %v1204_v43  ;;  %v1244_v1 = vmax.f32 %v1228_v55, 0.0  ;;  %v3871_v33 = vld [vmem:[%s6083_s2 + $0x70] sm:$0xff] }
 0x202   : > { %v1159_v60 = vpop.f32.mrf.mxu0 }
 0x203   : > { %v1206_v45 = vadd.f32 %v1159_v60, %v998_v31  ;;  %v1230_v58 = vadd.f32 %v5158_v10, %v1207_v50  ;;  %v3872_v31 = vld [vmem:[%s6083_s2 + $0x78] sm:$0xff]  ;;  %v1492_v50 = vld [vmem:[%s6088_s7 + $0x20] sm:$0xff] }
 0x204   : > { %v4436_v61 = vpop.f32.mrf.mxu0 }
 0x205   : > { %v1209_v17 = vadd.f32 %v4436_v61, %v1013_v12  ;;  %v1229_v60 = vadd.f32 %v5158_v10, %v1206_v45  ;;  %v1256_v12 = vld [vmem:[%s6083_s2 + $0x18] sm:$0xff]  ;;  %v1490_v45 = vld [vmem:[%s6088_s7 + $0x10] sm:$0xff] }
 0x206   : > { %v1169_v63 = vpop.f32.mrf.mxu0 }
 0x207   : > { %v1208_v34 = vadd.f32 %v1169_v63, %v1008_v16  ;;  %v1232_v32 = vadd.f32 %v5158_v10, %v1209_v17  ;;  %v1246_v63 = vmax.f32 %v1230_v58, 0.0  ;;  %v1494_v16 = vld [vmem:[%s6088_s7 + $0x30] sm:$0xff]  ;;  %v3897_v58 = vld [vmem:[%s6088_s7 + $0x80] sm:$0xff] }
 0x208   : > { %v4439_v0 = vpop.f32.mrf.mxu0  ;;  %v3903_v17 = vld [vmem:[%s6088_s7 + $0xb0] sm:$0xff] }
 0x209   : > { %v1211_v8 = vadd.f32 %v4439_v0, %v1023_v3  ;;  %v1231_v56 = vadd.f32 %v5158_v10, %v1208_v34  ;;  %v1248_v61 = vmax.f32 %v1232_v32, 0.0  ;;  %v1245_v0 = vmax.f32 %v1229_v60, 0.0  ;;  %v1493_v34 = vld [vmem:[%s6088_s7 + $0x28] sm:$0xff]  ;;  %v3901_v32 = vld [vmem:[%s6088_s7 + $0xa0] sm:$0xff] }
 0x20a   : > { %v1179_v2 = vpop.f32.mrf.mxu0  ;;  %v1242_v3 = vmax.f32 %v1226_v52, 0.0 }
 0x20b   : > { %v1210_v13 = vadd.f32 %v1179_v2, %v1018_v6  ;;  %v1234_v18 = vadd.f32 %v5158_v10, %v1211_v8  ;;  %v1247_v62 = vmax.f32 %v1231_v56, 0.0  ;;  %v1243_v2 = vmax.f32 %v1227_v57, 0.0  ;;  %v1254_v6 = vld [vmem:[%s6083_s2 + $0x8] sm:$0xff]  ;;  %v1255_v8 = vld [vmem:[%s6083_s2 + $0x10] sm:$0xff] }
 0x20c   : > { %v4442_v5 = vpop.f32.mrf.mxu0  ;;  %v3899_v56 = vld [vmem:[%s6088_s7 + $0x90] sm:$0xff] }
 0x20d   : > { %v1213_v9 = vadd.f32 %v4442_v5, %v1033_v4  ;;  %v1233_v35 = vadd.f32 %v5158_v10, %v1210_v13  ;;  %v1250_v53 = vmax.f32 %v1234_v18, 0.0  ;;  %v1239_v4 = vmax.f32 %v1223_v37, 0.0  ;;  %v3868_v13 = vld [vmem:[%s6083_s2 + $0x58] sm:$0xff]  ;;  %v1258_v18 = vld [vmem:[%s6083_s2 + $0x28] sm:$0xff] }
 0x20e   : > { %v1189_v11 = vpop.f32.mrf.mxu0  ;;  %v1237_v5 = vmax.f32 %v1221_v46, 0.0 }
 0x20f   : > { %v1236_v14 = vadd.f32 %v5158_v10, %v1213_v9  ;;  %v1212_v15 = vadd.f32 %v1189_v11, %v1028_v7  ;;  %v1249_v59 = vmax.f32 %v1233_v35, 0.0  ;;  %v3866_v7 = vld [vmem:[%s6083_s2 + $0x48] sm:$0xff]  ;;  %v3867_v9 = vld [vmem:[%s6083_s2 + $0x50] sm:$0xff]  ;;  %v3904_v11 = vld [vmem:[%s6088_s7 + $0xb8] sm:$0xff] }
 0x210   : > { %v3902_v35 = vld [vmem:[%s6088_s7 + $0xa8] sm:$0xff] }
 0x211   : > { %v1252_v28 = vmax.f32 %v1236_v14, 0.0  ;;  %v1235_v29 = vadd.f32 %v5158_v10, %v1212_v15  ;;  %v1495_v10 = vld [vmem:[%s6088_s7 + $0x38] sm:$0xff]  ;;  %v1257_v14 = vld [vmem:[%s6083_s2 + $0x20] sm:$0xff] }
 0x212   : > { %v3869_v15 = vld [vmem:[%s6083_s2 + $0x60] sm:$0xff] }
 0x213   : > { %v1251_v36 = vmax.f32 %v1235_v29, 0.0  ;;  %4443 = vmatprep.subr.mxu1 %v1252_v28  ;;  %4487 = vmatprep.subr.mxu0 %v1252_v28  ;;  %v1259_v29 = vld [vmem:[%s6083_s2 + $0x30] sm:$0xff] }
 0x214   : > { %4444 = vmatpush3.msra.mxu1 %v1252_v28  ;;  %4488 = vmatpush3.msra.mxu0 %v1252_v28  ;;  %v3870_v28 = vld [vmem:[%s6083_s2 + $0x68] sm:$0xff] }
 0x215   : > { %4445 = vmatprep.subr.mxu1 %v1251_v36  ;;  %4489 = vmatprep.subr.mxu0 %v1251_v36 }
 0x216   : > { %4446 = vmatpush3.msra.mxu1 %v1251_v36  ;;  %4490 = vmatpush3.msra.mxu0 %v1251_v36  ;;  %v1260_v36 = vld [vmem:[%s6083_s2 + $0x38] sm:$0xff] }
 0x217   : > { %4447 = vmatprep.subr.mxu1 %v1250_v53  ;;  %4491 = vmatprep.subr.mxu0 %v1250_v53 }
 0x218   : > { %4448 = vmatpush3.msra.mxu1 %v1250_v53  ;;  %4492 = vmatpush3.msra.mxu0 %v1250_v53  ;;  %v1491_v53 = vld [vmem:[%s6088_s7 + $0x18] sm:$0xff] }
 0x219   : > { %4449 = vmatprep.subr.mxu1 %v1249_v59  ;;  %4493 = vmatprep.subr.mxu0 %v1249_v59 }
 0x21a   : > { %4450 = vmatpush3.msra.mxu1 %v1249_v59  ;;  %4494 = vmatpush3.msra.mxu0 %v1249_v59  ;;  %v1489_v59 = vld [vmem:[%s6088_s7 + $0x8] sm:$0xff] }
 0x21b   : > { %4451 = vmatprep.subr.mxu1 %v1248_v61  ;;  %4495 = vmatprep.subr.mxu0 %v1248_v61 }
 0x21c   : > { %4452 = vmatpush3.msra.mxu1 %v1248_v61  ;;  %4496 = vmatpush3.msra.mxu0 %v1248_v61  ;;  %v3888_v61 = vld [vmem:[%s6088_s7 + $0x78] sm:$0xff] }
 0x21d   : > { %4453 = vmatprep.subr.mxu1 %v1247_v62  ;;  %4497 = vmatprep.subr.mxu0 %v1247_v62 }
 0x21e   : > { %4454 = vmatpush3.msra.mxu1 %v1247_v62  ;;  %4498 = vmatpush3.msra.mxu0 %v1247_v62 }
 0x21f   : > { %4455 = vmatprep.subr.mxu1 %v1246_v63  ;;  %4499 = vmatprep.subr.mxu0 %v1246_v63 }
 0x220   : > { %4456 = vmatpush3.msra.mxu1 %v1246_v63  ;;  %4500 = vmatpush3.msra.mxu0 %v1246_v63 }
 0x221   : > { %4457 = vmatprep.subr.mxu1 %v1245_v0  ;;  %4501 = vmatprep.subr.mxu0 %v1245_v0 }
 0x222   : > { %4458 = vmatpush3.msra.mxu1 %v1245_v0  ;;  %4502 = vmatpush3.msra.mxu0 %v1245_v0 }
 0x223   : > { %4459 = vmatprep.subr.mxu1 %v1244_v1  ;;  %4503 = vmatprep.subr.mxu0 %v1244_v1 }
 0x224   : > { %4460 = vmatpush3.msra.mxu1 %v1244_v1  ;;  %4504 = vmatpush3.msra.mxu0 %v1244_v1  ;;  %v3886_v1 = vld [vmem:[%s6088_s7 + $0x68] sm:$0xff] }
 0x225   : > { %4461 = vmatprep.subr.mxu1 %v1243_v2  ;;  %4505 = vmatprep.subr.mxu0 %v1243_v2 }
 0x226   : > { %4462 = vmatpush3.msra.mxu1 %v1243_v2  ;;  %4506 = vmatpush3.msra.mxu0 %v1243_v2 }
 0x227   : > { %4463 = vmatprep.subr.mxu1 %v1242_v3  ;;  %4507 = vmatprep.subr.mxu0 %v1242_v3 }
 0x228   : > { %4464 = vmatpush3.msra.mxu1 %v1242_v3  ;;  %4508 = vmatpush3.msra.mxu0 %v1242_v3 }
 0x229   : > { %4465 = vmatprep.subr.mxu1 %v1241_v51  ;;  %4509 = vmatprep.subr.mxu0 %v1241_v51 }
 0x22a   : > { %4466 = vmatpush3.msra.mxu1 %v1241_v51  ;;  %4510 = vmatpush3.msra.mxu0 %v1241_v51  ;;  %v3883_v51 = vld [vmem:[%s6088_s7 + $0x50] sm:$0xff] }
 0x22b   : > { %4467 = vmatprep.subr.mxu1 %v1240_v38  ;;  %4511 = vmatprep.subr.mxu0 %v1240_v38 }
 0x22c   : > { %4468 = vmatpush3.msra.mxu1 %v1240_v38  ;;  %4512 = vmatpush3.msra.mxu0 %v1240_v38  ;;  %v3882_v38 = vld [vmem:[%s6088_s7 + $0x48] sm:$0xff] }
 0x22d   : > { %4469 = vmatprep.subr.mxu1 %v1239_v4  ;;  %4513 = vmatprep.subr.mxu0 %v1239_v4 }
 0x22e   : > { %4470 = vmatpush3.msra.mxu1 %v1239_v4  ;;  %4514 = vmatpush3.msra.mxu0 %v1239_v4  ;;  %v3881_v4 = vld [vmem:[%s6088_s7 + $0x40] sm:$0xff] }
 0x22f   : > { %4471 = vmatprep.subr.mxu1 %v1238_v48  ;;  %4515 = vmatprep.subr.mxu0 %v1238_v48 }
 0x230   : > { %4472 = vmatpush3.msra.mxu1 %v1238_v48  ;;  %4516 = vmatpush3.msra.mxu0 %v1238_v48  ;;  %v1854_v48 = vld [vmem:[%s6084_s3] sm:$0xff] }
 0x231   : > { %4473 = vmatprep.subr.mxu1 %v1237_v5  ;;  %4517 = vmatprep.subr.mxu0 %v1237_v5 }
 0x232   : > { %4474 = vmatpush3.msra.mxu1 %v1237_v5  ;;  %4518 = vmatpush3.msra.mxu0 %v1237_v5  ;;  %v3921_v5 = vld [vmem:[%s6084_s3 + $0x40] sm:$0xff] }
 0x233   : > { %4476 = vmatmul.mubr.f32.vlgmr.msra.gmra.mxu1 %v1254_v6  ;;  %4520 = vmatmul.mubr.f32.vlgmr.msra.gmra.mxu0 %v3866_v7 }
 0x234   : > { %4478 = vmatprep.mubr.f32.mxu1 %v1255_v8  ;;  %4522 = vmatprep.mubr.f32.mxu0 %v3867_v9 }
 0x235   : > { %4531 = vmatprep.subr.mxu1 %v1495_v10  ;;  %4587 = vmatprep.subr.mxu0 %v3904_v11 }
 0x236   : > { %4532 = vmatpush3.msra.mxu1 %v1495_v10  ;;  %4588 = vmatpush3.msra.mxu0 %v3904_v11 }
 0x237   : > { %4479 = vmatmul.mubr.f32.gmra.mxu1 %v1256_v12  ;;  %4523 = vmatmul.mubr.f32.gmra.mxu0 %v3868_v13 }
 0x238   : > { %4481 = vmatprep.mubr.f32.mxu1 %v1257_v14  ;;  %4525 = vmatprep.mubr.f32.mxu0 %v3869_v15 }
 0x239   : > { %4533 = vmatprep.subr.mxu1 %v1494_v16  ;;  %4589 = vmatprep.subr.mxu0 %v3903_v17 }
 0x23a   : > { %4534 = vmatpush3.msra.mxu1 %v1494_v16  ;;  %4590 = vmatpush3.msra.mxu0 %v3903_v17 }
 0x23b   : > { %4482 = vmatmul.mubr.f32.gmra.mxu1 %v1258_v18  ;;  %4526 = vmatmul.mubr.f32.gmra.mxu0 %v3870_v28 }
 0x23c   : > { %4484 = vmatprep.mubr.f32.mxu1 %v1259_v29  ;;  %4528 = vmatprep.mubr.f32.mxu0 %v3871_v33 }
 0x23d   : > { %4535 = vmatprep.subr.mxu1 %v1493_v34  ;;  %4591 = vmatprep.subr.mxu0 %v3902_v35 }
 0x23e   : > { %4536 = vmatpush3.msra.mxu1 %v1493_v34  ;;  %4592 = vmatpush3.msra.mxu0 %v3902_v35  ;;  %v1855_v34 = vld [vmem:[%s6084_s3 + $0x8] sm:$0xff] }
 0x23f   : > { %4485 = vmatmul.mubr.f32.gmra.mxu1 %v1260_v36  ;;  %4529 = vmatmul.mubr.f32.gmra.mxu0 %v3872_v31  ;;  %v3922_v35 = vld [vmem:[%s6084_s3 + $0x48] sm:$0xff]  ;;  %v1856_v36 = vld [vmem:[%s6084_s3 + $0x10] sm:$0xff] }
 0x240   : > { %4537 = vmatprep.subr.mxu1 %v1492_v50  ;;  %4593 = vmatprep.subr.mxu0 %v3901_v32  ;;  %v3923_v31 = vld [vmem:[%s6084_s3 + $0x50] sm:$0xff] }
 0x241   : > { %4538 = vmatpush3.msra.mxu1 %v1492_v50  ;;  %4594 = vmatpush3.msra.mxu0 %v3901_v32  ;;  %v1857_v50 = vld [vmem:[%s6084_s3 + $0x18] sm:$0xff] }
 0x242   : > { %4539 = vmatprep.subr.mxu1 %v1491_v53  ;;  %4595 = vmatprep.subr.mxu0 %v3900_v27  ;;  %v3924_v32 = vld [vmem:[%s6084_s3 + $0x58] sm:$0xff] }
 0x243   : > { %4540 = vmatpush3.msra.mxu1 %v1491_v53  ;;  %4596 = vmatpush3.msra.mxu0 %v3900_v27  ;;  %v1858_v53 = vld [vmem:[%s6084_s3 + $0x20] sm:$0xff] }
 0x244   : > { %4541 = vmatprep.subr.mxu1 %v1490_v45  ;;  %4597 = vmatprep.subr.mxu0 %v3899_v56  ;;  %v3925_v27 = vld [vmem:[%s6084_s3 + $0x60] sm:$0xff] }
 0x245   : > { %4542 = vmatpush3.msra.mxu1 %v1490_v45  ;;  %4598 = vmatpush3.msra.mxu0 %v3899_v56  ;;  %v1859_v45 = vld [vmem:[%s6084_s3 + $0x28] sm:$0xff] }
 0x246   : > { %4543 = vmatprep.subr.mxu1 %v1489_v59  ;;  %4599 = vmatprep.subr.mxu0 %v3898_v30  ;;  %v3926_v56 = vld [vmem:[%s6084_s3 + $0x68] sm:$0xff] }
 0x247   : > { %4544 = vmatpush3.msra.mxu1 %v1489_v59  ;;  %4600 = vmatpush3.msra.mxu0 %v3898_v30  ;;  %v1860_v59 = vld [vmem:[%s6084_s3 + $0x30] sm:$0xff] }
 0x248   : > { %4545 = vmatprep.subr.mxu1 %v1488_v47  ;;  %4601 = vmatprep.subr.mxu0 %v3897_v58  ;;  %v3927_v30 = vld [vmem:[%s6084_s3 + $0x70] sm:$0xff] }
 0x249   : > { %4546 = vmatpush3.msra.mxu1 %v1488_v47  ;;  %4602 = vmatpush3.msra.mxu0 %v3897_v58  ;;  %v1861_v47 = vld [vmem:[%s6084_s3 + $0x38] sm:$0xff] }
 0x24a   : > { %4559 = vmatprep.subr.mxu1 %v3888_v61  ;;  %v3928_v58 = vld [vmem:[%s6084_s3 + $0x78] sm:$0xff] }
 0x2f3   : > { %v4477_v25 = vpop.f32.mrf.mxu1  ;;  %v4521_v43 = vpop.f32.mrf.mxu0 }
 0x2f4   : > { %v1481_v44 = vmax.f32 %v4477_v25, %v4521_v43  ;;  %v3942_v25 = vld [vmem:[%s6085_s4 + $0x20] sm:$0xff] }
 0x2f5   : > { %v1327_v60 = vpop.f32.mrf.mxu1  ;;  %v1441_v62 = vpop.f32.mrf.mxu0 }
 0x2f6   : > { %v1480_v26 = vmax.f32 %v1327_v60, %v1441_v62 }
 0x2f7   : > { %v4480_v55 = vpop.f32.mrf.mxu1  ;;  %v4524_v63 = vpop.f32.mrf.mxu0 }
 0x2f8   : > { %4547 = vmatprep.mubr.msk.f32.mxu1 %vm1496_vm2, %v1480_v26  ;;  %4603 = vmatprep.mubr.msk.f32.mxu0 %vm1496_vm2, %v1480_v26  ;;  %v1483_v24 = vmax.f32 %v4480_v55, %v4524_v63 }
 0x2f9   : > { %v1337_v41 = vpop.f32.mrf.mxu1  ;;  %v1451_v57 = vpop.f32.mrf.mxu0  ;;  %4548 = vmatmul.mubr.msk.f32.vlgmr.msra.gmra.mxu1 %vm1496_vm2, %v1481_v44  ;;  %4604 = vmatmul.mubr.msk.f32.vlgmr.msra.gmra.mxu0 %vm1496_vm2, %v1481_v44 }
 0x2fa   : > { %v1482_v0 = vmax.f32 %v1337_v41, %v1451_v57  ;;  %4560 = vmatpush3.msra.mxu1 %v3888_v61  ;;  %v2160_v61 = vld [vmem:[%s6085_s4] sm:$0xff] }
 0x2fb   : > { %v4483_v42 = vpop.f32.mrf.mxu1  ;;  %v4527_v52 = vpop.f32.mrf.mxu0  ;;  %4561 = vmatprep.subr.mxu1 %v3887_v23 }
 0x2fc   : > { %4550 = vmatprep.mubr.msk.f32.mxu1 %vm1496_vm2, %v1482_v0  ;;  %4562 = vmatpush3.msra.mxu1 %v3887_v23  ;;  %v1485_v3 = vmax.f32 %v4483_v42, %v4527_v52 }
 0x2fd   : > { %4606 = vmatprep.mubr.msk.f32.mxu0 %vm1496_vm2, %v1482_v0  ;;  %v1347_v21 = vpop.f32.mrf.mxu1  ;;  %v1461_v39 = vpop.f32.mrf.mxu0  ;;  %4551 = vmatmul.mubr.msk.f32.gmra.mxu1 %vm1496_vm2, %v1483_v24 }
 0x2fe   : > { %v1484_v2 = vmax.f32 %v1347_v21, %v1461_v39  ;;  %4563 = vmatprep.subr.mxu1 %v3886_v1  ;;  %4607 = vmatmul.mubr.msk.f32.gmra.mxu0 %vm1496_vm2, %v1483_v24 }
 0x2ff   : > { %4564 = vmatpush3.msra.mxu1 %v3886_v1  ;;  %v4486_v22 = vpop.f32.mrf.mxu1  ;;  %v4530_v40 = vpop.f32.mrf.mxu0 }
 0x300   : > { %4565 = vmatprep.subr.mxu1 %v3885_v54  ;;  %4553 = vmatprep.mubr.msk.f32.mxu1 %vm1496_vm2, %v1484_v2  ;;  %v1487_v46 = vmax.f32 %v4486_v22, %v4530_v40 }
 0x301   : > { %4566 = vmatpush3.msra.mxu1 %v3885_v54  ;;  %4609 = vmatprep.mubr.msk.f32.mxu0 %vm1496_vm2, %v1484_v2  ;;  %v1357_v19 = vpop.f32.mrf.mxu1  ;;  %v1471_v37 = vpop.f32.mrf.mxu0 }
 0x302   : > { %v1486_v20 = vmax.f32 %v1357_v19, %v1471_v37  ;;  %4554 = vmatmul.mubr.msk.f32.gmra.mxu1 %vm1496_vm2, %v1485_v3  ;;  %4567 = vmatprep.subr.mxu1 %v3884_v49 }
 0x303   : > { %4610 = vmatmul.mubr.msk.f32.gmra.mxu0 %vm1496_vm2, %v1485_v3  ;;  %4568 = vmatpush3.msra.mxu1 %v3884_v49 }
 0x304   : > { %4569 = vmatprep.subr.mxu1 %v3883_v51  ;;  %4556 = vmatprep.mubr.msk.f32.mxu1 %vm1496_vm2, %v1486_v20 }
 0x305   : > { %4570 = vmatpush3.msra.mxu1 %v3883_v51  ;;  %4612 = vmatprep.mubr.msk.f32.mxu0 %vm1496_vm2, %v1486_v20 }
 0x306   : > { %4557 = vmatmul.mubr.msk.f32.gmra.mxu1 %vm1496_vm2, %v1487_v46  ;;  %4571 = vmatprep.subr.mxu1 %v3882_v38 }
 0x307   : > { %4613 = vmatmul.mubr.msk.f32.gmra.mxu0 %vm1496_vm2, %v1487_v46  ;;  %4572 = vmatpush3.msra.mxu1 %v3882_v38 }
 0x308   : > { %4575 = vmatprep.mubr.msk.f32.mxu1 %vm1496_vm2, %v1480_v26  ;;  %4573 = vmatprep.subr.mxu1 %v3881_v4 }
 0x309   : > { %4574 = vmatpush3.msra.mxu1 %v3881_v4  ;;  %4659 = vmatprep.mubr.msk.f32.mxu0 %vm1496_vm2, %v3921_v5 }
 0x30a   : > { %4576 = vmatmul.mubr.msk.f32.vlgmr.msra.gmra.mxu1 %vm1496_vm2, %v1481_v44 }
 0x30b   : > { %4578 = vmatprep.mubr.msk.f32.mxu1 %vm1496_vm2, %v1482_v0 }
 0x30e   : > { %4579 = vmatmul.mubr.msk.f32.gmra.mxu1 %vm1496_vm2, %v1483_v24 }
 0x30f   : > { %4581 = vmatprep.mubr.msk.f32.mxu1 %vm1496_vm2, %v1484_v2 }
 0x312   : > { %4582 = vmatmul.mubr.msk.f32.gmra.mxu1 %vm1496_vm2, %v1485_v3 }
 0x313   : > { %4584 = vmatprep.mubr.msk.f32.mxu1 %vm1496_vm2, %v1486_v20 }
 0x316   : > { %4585 = vmatmul.mubr.msk.f32.gmra.mxu1 %vm1496_vm2, %v1487_v46 }
 0x317   : > { %4631 = vmatprep.mubr.msk.f32.mxu1 %vm1496_vm2, %v1854_v48  ;;  %v3937_v48 = vld [vmem:[%s6089_s8] ss:$0 sm:$0xff] }
 0x3b9   : > { %v4549_v6 = vpop.f32.mrf.mxu1  ;;  %v4605_v7 = vpop.f32.mrf.mxu0 }
 0x3bb   : > { %v1587_v8 = vpop.f32.mrf.mxu1  ;;  %v1815_v9 = vpop.f32.mrf.mxu0 }
 0x3bd   : > { %v4552_v10 = vpop.f32.mrf.mxu1 }
 0x3be   : > { %v4608_v11 = vpop.f32.mrf.mxu0 }
 0x3bf   : > { %v1597_v12 = vpop.f32.mrf.mxu1 }
 0x3c0   : > { %v1825_v13 = vpop.f32.mrf.mxu0 }
 0x3c2   : > { %v4555_v14 = vpop.f32.mrf.mxu1 }
 0x3c3   : > { %v4611_v15 = vpop.f32.mrf.mxu0 }
 0x3c4   : > { %v1607_v16 = vpop.f32.mrf.mxu1 }
 0x3c5   : > { %v1835_v17 = vpop.f32.mrf.mxu0 }
 0x3c6   : > { %v4558_v18 = vpop.f32.mrf.mxu1 }
 0x3c7   : > { %v4614_v28 = vpop.f32.mrf.mxu0  ;;  %4615 = vmatprep.subr.mxu1 %v4558_v18 }
 0x3c8   : > { %4643 = vmatprep.subr.mxu0 %v4614_v28  ;;  %v1617_v29 = vpop.f32.mrf.mxu1  ;;  %4616 = vmatpush3.msra.mxu1 %v4558_v18 }
 0x3c9   : > { %v1845_v33 = vpop.f32.mrf.mxu0  ;;  %4644 = vmatpush3.msra.mxu0 %v4614_v28  ;;  %4617 = vmatprep.subr.mxu1 %v1617_v29 }
 0x3ca   : > { %4645 = vmatprep.subr.mxu0 %v1845_v33  ;;  %4618 = vmatpush3.msra.mxu1 %v1617_v29  ;;  %v4577_v43 = vpop.f32.mrf.mxu1 }
 0x3cb   : > { %4646 = vmatpush3.msra.mxu0 %v1845_v33  ;;  %4619 = vmatprep.subr.mxu1 %v4555_v14 }
 0x3cc   : > { %4647 = vmatprep.subr.mxu0 %v4611_v15  ;;  %4620 = vmatpush3.msra.mxu1 %v4555_v14  ;;  %v1701_v60 = vpop.f32.mrf.mxu1 }
 0x3cd   : > { %4648 = vmatpush3.msra.mxu0 %v4611_v15  ;;  %4621 = vmatprep.subr.mxu1 %v1607_v16 }
 0x3ce   : > { %4649 = vmatprep.subr.mxu0 %v1835_v17  ;;  %4622 = vmatpush3.msra.mxu1 %v1607_v16  ;;  %v4580_v62 = vpop.f32.mrf.mxu1 }
 0x3cf   : > { %4650 = vmatpush3.msra.mxu0 %v1835_v17  ;;  %4623 = vmatprep.subr.mxu1 %v4552_v10 }
 0x3d0   : > { %4651 = vmatprep.subr.mxu0 %v4608_v11  ;;  %4624 = vmatpush3.msra.mxu1 %v4552_v10  ;;  %v1711_v26 = vpop.f32.mrf.mxu1 }
 0x3d1   : > { %4652 = vmatpush3.msra.mxu0 %v4608_v11  ;;  %4625 = vmatprep.subr.mxu1 %v1597_v12 }
 0x3d2   : > { %4653 = vmatprep.subr.mxu0 %v1825_v13  ;;  %4626 = vmatpush3.msra.mxu1 %v1597_v12  ;;  %v4583_v44 = vpop.f32.mrf.mxu1 }
 0x3d3   : > { %4654 = vmatpush3.msra.mxu0 %v1825_v13  ;;  %4627 = vmatprep.subr.mxu1 %v4549_v6 }
 0x3d4   : > { %4655 = vmatprep.subr.mxu0 %v4605_v7  ;;  %4628 = vmatpush3.msra.mxu1 %v4549_v6  ;;  %v1721_v55 = vpop.f32.mrf.mxu1 }
 0x3d5   : > { %4656 = vmatpush3.msra.mxu0 %v4605_v7  ;;  %4629 = vmatprep.subr.mxu1 %v1587_v8 }
 0x3d6   : > { %4657 = vmatprep.subr.mxu0 %v1815_v9  ;;  %4630 = vmatpush3.msra.mxu1 %v1587_v8  ;;  %v4586_v63 = vpop.f32.mrf.mxu1 }
 0x3d7   : > { %4658 = vmatpush3.msra.mxu0 %v1815_v9  ;;  %4632 = vmatmul.mubr.msk.f32.vlgmr.msra.gmra.mxu1 %vm1496_vm2, %v1855_v34 }
 0x3d8   : > { %4660 = vmatmul.mubr.msk.f32.vlgmr.msra.gmra.mxu0 %vm1496_vm2, %v3922_v35  ;;  %4634 = vmatprep.mubr.msk.f32.mxu1 %vm1496_vm2, %v1856_v36  ;;  %v1731_v23 = vpop.f32.mrf.mxu1 }
 0x3d9   : > { %4662 = vmatprep.mubr.msk.f32.mxu0 %vm1496_vm2, %v3923_v31 }
 0x3db   : > { %4635 = vmatmul.mubr.msk.f32.gmra.mxu1 %vm1496_vm2, %v1857_v50 }
 0x3dc   : > { %4663 = vmatmul.mubr.msk.f32.gmra.mxu0 %vm1496_vm2, %v3924_v32  ;;  %4637 = vmatprep.mubr.msk.f32.mxu1 %vm1496_vm2, %v1858_v53 }
 0x3dd   : > { %4665 = vmatprep.mubr.msk.f32.mxu0 %vm1496_vm2, %v3925_v27 }
 0x3df   : > { %4638 = vmatmul.mubr.msk.f32.gmra.mxu1 %vm1496_vm2, %v1859_v45 }
 0x3e0   : > { %4666 = vmatmul.mubr.msk.f32.gmra.mxu0 %vm1496_vm2, %v3926_v56  ;;  %4640 = vmatprep.mubr.msk.f32.mxu1 %vm1496_vm2, %v1860_v59  ;;  %v2161_v56 = vld [vmem:[%s6085_s4 + $0x8] sm:$0xff] }
 0x3e1   : > { %4668 = vmatprep.mubr.msk.f32.mxu0 %vm1496_vm2, %v3927_v30  ;;  %v3943_v59 = vld [vmem:[%s6085_s4 + $0x28] sm:$0xff]  ;;  %v2162_v30 = vld [vmem:[%s6085_s4 + $0x10] sm:$0xff] }
 0x3e3   : > { %4641 = vmatmul.mubr.msk.f32.gmra.mxu1 %vm1496_vm2, %v1861_v47  ;;  %v3944_v47 = vld [vmem:[%s6085_s4 + $0x30] sm:$0xff] }
 0x3e4   : > { %4669 = vmatmul.mubr.msk.f32.gmra.mxu0 %vm1496_vm2, %v3928_v58  ;;  %4687 = vmatprep.mubr.msk.f32.mxu1 %vm1496_vm2, %v2160_v61  ;;  %v2374_v58 = vld [vmem:[%s6090_s9 + $0x38] sm:$0xff]  ;;  %v2373_v61 = vld [vmem:[%s6090_s9 + $0x30] sm:$0xff] }
 0x3e5   : > { %4709 = vmatprep.mubr.msk.f32.mxu0 %vm1496_vm2, %v3942_v25  ;;  %v2163_v25 = vld [vmem:[%s6085_s4 + $0x18] sm:$0xff] }
 0x497   : > { %v4633_v41 = vpop.f32.mrf.mxu1 }
 0x498   : > { %v4661_v57 = vpop.f32.mrf.mxu0  ;;  %v1958_v10 = vadd.f32 %v4633_v41, %v4577_v43  ;;  %v3945_v43 = vld [vmem:[%s6085_s4 + $0x38] sm:$0xff] }
 0x499   : > { %v1952_v0 = vpop.f32.mrf.mxu1  ;;  %v5463_v41 = vld [vmem:[%s6090_s9 + $0xb8] sm:$0xff] }
 0x49a   : > { %v2090_v24 = vpop.f32.mrf.mxu0  ;;  %v1953_v15 = vadd.f32 %v1952_v0, %v1701_v60  ;;  %v2130_v28 = vadd.f32 %v4661_v57, %v1958_v10  ;;  %v2372_v60 = vld [vmem:[%s6090_s9 + $0x28] sm:$0xff]  ;;  %v2446_v10 = vlaneseq }
 0x49b   : > { %v4636_v42 = vpop.f32.mrf.mxu1 }
 0x49c   : > { %v4664_v52 = vpop.f32.mrf.mxu0  ;;  %v1968_v20 = vadd.f32 %v4636_v42, %v4580_v62  ;;  %v2129_v34 = vadd.f32 %v2090_v24, %v1953_v15  ;;  %v2145_v31 = vadd.f32 %v3937_v48, %v2130_v28  ;;  %v2371_v62 = vld [vmem:[%s6090_s9 + $0x20] sm:$0xff] }
 0x49d   : > { %v1962_v1 = vpop.f32.mrf.mxu1 }
 0x49e   : > { %v2100_v21 = vpop.f32.mrf.mxu0  ;;  %v1963_v6 = vadd.f32 %v1962_v1, %v1711_v26  ;;  %v2132_v11 = vadd.f32 %v4664_v52, %v1968_v20  ;;  %v2144_v32 = vadd.f32 %v3937_v48, %v2129_v34  ;;  %v2153_v27 = vmax.f32 %v2145_v31, 0.0  ;;  %v2370_v26 = vld [vmem:[%s6090_s9 + $0x18] sm:$0xff]  ;;  %v5470_v1 = vld [vmem:[%s6090_s9 + $0xb0] sm:$0xff] }
 0x49f   : > { %v4639_v39 = vpop.f32.mrf.mxu1  ;;  %v5514_v20 = vld [vmem:[%s6090_s9 + $0x78] sm:$0xff] }
 0x4a0   : > { %v4667_v54 = vpop.f32.mrf.mxu0  ;;  %v1978_v22 = vadd.f32 %v4639_v39, %v4583_v44  ;;  %v2131_v16 = vadd.f32 %v2100_v21, %v1963_v6  ;;  %v2147_v29 = vadd.f32 %v3937_v48, %v2132_v11  ;;  %v2152_v45 = vmax.f32 %v2144_v32, 0.0  ;;  %v2369_v44 = vld [vmem:[%s6090_s9 + $0x10] sm:$0xff] }
 0x4a1   : > { %v1972_v2 = vpop.f32.mrf.mxu1  ;;  %v5567_v11 = vshrl.u32 %v2446_v10, 7  ;;  %v5680_v10 = vld [vmem:[%s6090_s9 + $0x118] sm:$0xff] }
 0x4a2   : > { %v2110_v40 = vpop.f32.mrf.mxu0  ;;  %v1973_v3 = vadd.f32 %v1972_v2, %v1721_v55  ;;  %v2134_v38 = vadd.f32 %v4667_v54, %v1978_v22  ;;  %v2146_v35 = vadd.f32 %v3937_v48, %v2131_v16  ;;  %v2155_v50 = vmax.f32 %v2147_v29, 0.0  ;;  %v2368_v55 = vld [vmem:[%s6090_s9 + $0x8] sm:$0xff]  ;;  %v5481_v2 = vld [vmem:[%s6090_s9 + $0xa0] sm:$0xff]  ;;  %v5488_v22 = vld [vmem:[%s6090_s9 + $0x98] sm:$0xff] }
 0x4a3   : > { %v4642_v49 = vpop.f32.mrf.mxu1  ;;  %v5475_v54 = vld [vmem:[%s6090_s9 + $0xa8] sm:$0xff]  ;;  %v6092_v15 = vsub.s32 1, %v5567_v11 }
 0x4a4   : > { %v1988_v19 = vadd.f32 %v4642_v49, %v4586_v63  ;;  %v4670_v37 = vpop.f32.mrf.mxu0  ;;  %v2133_v7 = vadd.f32 %v2110_v40, %v1973_v3  ;;  %v2149_v12 = vadd.f32 %v3937_v48, %v2134_v38  ;;  %v2154_v53 = vmax.f32 %v2146_v35, 0.0  ;;  %v2367_v63 = vld [vmem:[%s6090_s9] sm:$0xff]  ;;  %v5494_v49 = vld [vmem:[%s6090_s9 + $0x90] sm:$0xff] }
 0x4a5   : > { %v1982_v51 = vpop.f32.mrf.mxu1 }
 0x4a6   : > { %v2136_v46 = vadd.f32 %v4670_v37, %v1988_v19  ;;  %v1983_v4 = vadd.f32 %v1982_v51, %v1731_v23  ;;  %v2120_v5 = vpop.f32.mrf.mxu0  ;;  %v2148_v17 = vadd.f32 %v3937_v48, %v2133_v7  ;;  %v2157_v33 = vmax.f32 %v2149_v12, 0.0  ;;  %v5500_v37 = vld [vmem:[%s6090_s9 + $0x88] sm:$0xff]  ;;  %v5507_v51 = vld [vmem:[%s6090_s9 + $0x80] sm:$0xff]  ;;  %v5546_v7 = vld [vmem:[%s6090_s9 + $0x50] sm:$0xff] }
 0x4a7   : > { %v6093_v23 = vmov 0.0   ;;  %v5570_v12 = vsub.s32 0, %v5567_v11 }
 0x4a8   : > { %v2151_v8 = vadd.f32 %v3937_v48, %v2136_v46  ;;  %v2135_v9 = vadd.f32 %v2120_v5, %v1983_v4  ;;  %v2156_v36 = vmax.f32 %v2148_v17, 0.0  ;;  %v5520_v46 = vld [vmem:[%s6090_s9 + $0x70] sm:$0xff]  ;;  %v5526_v4 = vld [vmem:[%s6090_s9 + $0x68] sm:$0xff]  ;;  %v5540_v5 = vld [vmem:[%s6090_s9 + $0x58] sm:$0xff] }
 0x4a9   : > { %6111 = vst [vmem:[#allocation2_spill] sm:$0xff] %v5570_v12 }
 0x4aa   : > { %v2159_v13 = vmax.f32 %v2151_v8, 0.0  ;;  %v2150_v14 = vadd.f32 %v3937_v48, %v2135_v9  ;;  %v5533_v48 = vld [vmem:[%s6090_s9 + $0x60] sm:$0xff]  ;;  %v5552_v8 = vld [vmem:[%s6090_s9 + $0x48] sm:$0xff] }
 0x4ab   : > { %v5559_v9 = vld [vmem:[%s6090_s9 + $0x40] sm:$0xff] }
 0x4ac   : > { %v2158_v18 = vmax.f32 %v2150_v14, 0.0  ;;  %4671 = vmatprep.subr.mxu1 %v2159_v13  ;;  %4693 = vmatprep.subr.mxu0 %v2159_v13 }
 0x4ad   : > { %4672 = vmatpush3.msra.mxu1 %v2159_v13  ;;  %4694 = vmatpush3.msra.mxu0 %v2159_v13  ;;  %v3950_v13 = vld [vmem:[%s6090_s9 + $0x1c0] ss:$8 sm:$0x3] }
 0x4ae   : > { %4673 = vmatprep.subr.mxu1 %v2158_v18  ;;  %4695 = vmatprep.subr.mxu0 %v2158_v18  ;;  %v2449_v17 = vrot.slane %v3950_v13, %v5570_v12  ;;  %v2453_v28 = vrot.slane %v3950_v13, %v6092_v15  ;;  %v5686_v13 = vld [vmem:[%s6090_s9 + $0x168] sm:$0xff] }
 0x4af   : > { %4674 = vmatpush3.msra.mxu1 %v2158_v18  ;;  %4696 = vmatpush3.msra.mxu0 %v2158_v18 }
 0x4b0   : > { %4675 = vmatprep.subr.mxu1 %v2157_v33  ;;  %4697 = vmatprep.subr.mxu0 %v2157_v33 }
 0x4b1   : > { %4676 = vmatpush3.msra.mxu1 %v2157_v33  ;;  %4698 = vmatpush3.msra.mxu0 %v2157_v33 }
 0x4b2   : > { %4677 = vmatprep.subr.mxu1 %v2156_v36  ;;  %4699 = vmatprep.subr.mxu0 %v2156_v36 }
 0x4b3   : > { %4678 = vmatpush3.msra.mxu1 %v2156_v36  ;;  %4700 = vmatpush3.msra.mxu0 %v2156_v36 }
 0x4b4   : > { %4679 = vmatprep.subr.mxu1 %v2155_v50  ;;  %4701 = vmatprep.subr.mxu0 %v2155_v50 }
 0x4b5   : > { %4680 = vmatpush3.msra.mxu1 %v2155_v50  ;;  %4702 = vmatpush3.msra.mxu0 %v2155_v50 }
 0x4b6   : > { %4681 = vmatprep.subr.mxu1 %v2154_v53  ;;  %4703 = vmatprep.subr.mxu0 %v2154_v53 }
 0x4b7   : > { %4682 = vmatpush3.msra.mxu1 %v2154_v53  ;;  %4704 = vmatpush3.msra.mxu0 %v2154_v53 }
 0x4b8   : > { %4683 = vmatprep.subr.mxu1 %v2153_v27  ;;  %4705 = vmatprep.subr.mxu0 %v2153_v27 }
 0x4b9   : > { %4684 = vmatpush3.msra.mxu1 %v2153_v27  ;;  %4706 = vmatpush3.msra.mxu0 %v2153_v27 }
 0x4ba   : > { %4685 = vmatprep.subr.mxu1 %v2152_v45  ;;  %4707 = vmatprep.subr.mxu0 %v2152_v45 }
 0x4bb   : > { %4686 = vmatpush3.msra.mxu1 %v2152_v45  ;;  %4708 = vmatpush3.msra.mxu0 %v2152_v45 }
 0x4bc   : > { %4688 = vmatmul.mubr.msk.f32.vlgmr.msra.gmra.mxu1 %vm1496_vm2, %v2161_v56  ;;  %4710 = vmatmul.mubr.msk.f32.vlgmr.msra.gmra.mxu0 %vm1496_vm2, %v3943_v59 }
 0x4bd   : > { %4690 = vmatprep.mubr.msk.f32.mxu1 %vm1496_vm2, %v2162_v30  ;;  %4712 = vmatprep.mubr.msk.f32.mxu0 %vm1496_vm2, %v3944_v47 }
 0x4be   : > { %2493 = vmatprep.subr.mxu1 %v2374_v58 }
 0x4bf   : > { %2494 = vmatpush1.msra.mxu1 %v2373_v61 }
 0x4c0   : > { %4691 = vmatmul.mubr.msk.f32.gmra.mxu1 %vm1496_vm2, %v2163_v25  ;;  %4713 = vmatmul.mubr.msk.f32.gmra.mxu0 %vm1496_vm2, %v3945_v43 }
 0x4c1   : > { %2495 = vmatprep.subr.mxu1 %v2372_v60  ;;  %2533 = vmatprep.mubr.f32.mxu1 %v6093_v23 }
 0x4c2   : > { %2496 = vmatpush1.msra.mxu1 %v2371_v62  ;;  %2720 = vmatprep.mubr.f32.mxu0 %v6093_v23 }
 0x4c3   : > { %2497 = vmatprep.subr.mxu1 %v2370_v26 }
 0x4c4   : > { %2498 = vmatpush1.msra.mxu1 %v2369_v44 }
 0x4c5   : > { %2499 = vmatprep.subr.mxu1 %v2368_v55  ;;  %v5601_v55 = vld [vmem:[%s6090_s9 + $0x1b8] sm:$0xff] }
 0x4c6   : > { %2500 = vmatpush1.msra.mxu1 %v2367_v63  ;;  %6116 = vst [vmem:[#allocation7_spill] sm:$0xff] %v5601_v55  ;;  %v5606_v63 = vld [vmem:[%s6090_s9 + $0x1b0] sm:$0xff]  ;;  %2672 = vmatprep.subr.mxu0 %v5601_v55 }
 0x4c7   : > { %2577 = vmatprep.subr.mxu1 %v5463_v41  ;;  %2673 = vmatpush1.msra.mxu0 %v5606_v63 }
 0x57c   : > { %v4689_v57 = vpop.f32.mrf.mxu1  ;;  %v4711_v0 = vpop.f32.mrf.mxu0 }
 0x57d   : > { %v2364_v40 = vmax.f32 %v4689_v57, %v4711_v0  ;;  %v5611_v57 = vld [vmem:[%s6090_s9 + $0x1a8] sm:$0xff]  ;;  %v5617_v0 = vld [vmem:[%s6090_s9 + $0x1a0] sm:$0xff] }
 0x57e   : > { %v2242_v24 = vpop.f32.mrf.mxu1  ;;  %v2344_v42 = vpop.f32.mrf.mxu0  ;;  %2674 = vmatprep.subr.mxu0 %v5611_v57 }
 0x57f   : > { %v2363_v52 = vmax.f32 %v2242_v24, %v2344_v42  ;;  %v5623_v24 = vld [vmem:[%s6090_s9 + $0x198] sm:$0xff]  ;;  %v5629_v42 = vld [vmem:[%s6090_s9 + $0x190] sm:$0xff]  ;;  %2675 = vmatpush1.msra.mxu0 %v5617_v0 }
 0x580   : > { %v4692_v21 = vpop.f32.mrf.mxu1  ;;  %v4714_v39 = vpop.f32.mrf.mxu0  ;;  %2676 = vmatprep.subr.mxu0 %v5623_v24 }
 0x581   : > { %3953 = vmatmul.mubr.msk.f32.vlgmr.msra.gmra.mxu1 %vm2456_vm3, %v2363_v52  ;;  %v2366_v6 = vmax.f32 %v4692_v21, %v4714_v39  ;;  %v5635_v52 = vld [vmem:[%s6090_s9 + $0x188] sm:$0xff]  ;;  %v5641_v21 = vld [vmem:[%s6090_s9 + $0x180] sm:$0xff]  ;;  %v5646_v39 = vld [vmem:[%s6090_s9 + $0x138] sm:$0xff]  ;;  %2677 = vmatpush1.msra.mxu0 %v5629_v42 }
 0x582   : > { %2578 = vmatpush1.msra.mxu1 %v5470_v1  ;;  %2539 = vmatprep.mubr.f32.mxu1 %v6093_v23  ;;  %v2252_v3 = vpop.f32.mrf.mxu1  ;;  %v2354_v19 = vpop.f32.mrf.mxu0 }
 0x583   : > { %2579 = vmatprep.subr.mxu1 %v5475_v54  ;;  %v2365_v38 = vmax.f32 %v2252_v3, %v2354_v19  ;;  %v5657_v3 = vld [vmem:[%s6090_s9 + $0x178] sm:$0xff]  ;;  %v5663_v19 = vld [vmem:[%s6090_s9 + $0x128] sm:$0xff]  ;;  %2678 = vmatprep.subr.mxu0 %v5635_v52 }
 0x584   : > { %2580 = vmatpush1.msra.mxu1 %v5481_v2  ;;  %2679 = vmatpush1.msra.mxu0 %v5641_v21 }
 0x585   : > { %3954 = vmatmul.mubr.msk.f32.gmra.mxu1 %vm2456_vm3, %v2364_v40  ;;  %2581 = vmatprep.subr.mxu1 %v5488_v22  ;;  %v5651_v40 = vld [vmem:[%s6090_s9 + $0x130] sm:$0xff] }
 0x586   : > { %2582 = vmatpush1.msra.mxu1 %v5494_v49  ;;  %2545 = vmatprep.mubr.f32.mxu1 %v6093_v23 }
 0x587   : > { %2583 = vmatprep.subr.mxu1 %v5500_v37  ;;  %2680 = vmatprep.subr.mxu0 %v5657_v3 }
 0x588   : > { %2584 = vmatpush1.msra.mxu1 %v5507_v51 }
 0x589   : > { %3955 = vmatmul.mubr.msk.f32.gmra.mxu1 %vm2456_vm3, %v2365_v38  ;;  %2585 = vmatprep.subr.mxu1 %v5514_v20  ;;  %v5668_v38 = vld [vmem:[%s6090_s9 + $0x120] sm:$0xff] }
 0x58a   : > { %2586 = vmatpush1.msra.mxu1 %v5520_v46  ;;  %2551 = vmatprep.mubr.f32.mxu1 %v6093_v23 }
 0x58b   : > { %2587 = vmatprep.subr.mxu1 %v5526_v4 }
 0x58c   : > { %2588 = vmatpush1.msra.mxu1 %v5533_v48 }
 0x58d   : > { %3956 = vmatmul.mubr.msk.f32.gmra.mxu1 %vm2456_vm3, %v2366_v6  ;;  %2589 = vmatprep.subr.mxu1 %v5540_v5  ;;  %v5674_v6 = vld [vmem:[%s6090_s9 + $0x170] sm:$0xff] }
 0x58e   : > { %2590 = vmatpush1.msra.mxu1 %v5546_v7  ;;  %2625 = vmatprep.mubr.f32.mxu1 %v6093_v23 }
 0x58f   : > { %2591 = vmatprep.subr.mxu1 %v5552_v8  ;;  %2681 = vmatpush1.msra.mxu0 %v5674_v6 }
 0x590   : > { %2592 = vmatpush1.msra.mxu1 %v5559_v9  ;;  %2682 = vmatprep.subr.mxu0 %v5686_v13 }
 0x591   : > { %2626 = vmatmul.mubr.f32.vlgmr.msra.gmra.mxu1 %v6093_v23  ;;  %2748 = vmatprep.subr.mxu1 %v5646_v39 }
 0x592   : > { %2796 = vmatprep.mubr.f32.mxu1 %v6093_v23  ;;  %2749 = vmatpush1.msra.mxu1 %v5651_v40 }
 0x593   : > { %2750 = vmatprep.subr.mxu1 %v5663_v19 }
 0x594   : > { %2751 = vmatpush1.msra.mxu1 %v5668_v38 }
 0x595   : > { %2752 = vmatprep.subr.mxu1 %v5680_v10 }
 0x641   : > { %v2535_v14 = vpop.f32.mrf.mxu1 }
 0x642   : > { %v2536_v45 = vadd.f32 %v2535_v14, %v2449_v17  ;;  %v5692_v14 = vld [vmem:[%s6090_s9 + $0x110] sm:$0xff] }
 0x643   : > { %v2537_v16 = vpop.f32.mrf.mxu1  ;;  %2753 = vmatpush1.msra.mxu1 %v5692_v14 }
 0x644   : > { %v2538_v61 = vadd.f32 %v2537_v16, %v2453_v28  ;;  %v5698_v16 = vld [vmem:[%s6090_s9 + $0x160] sm:$0xff] }
 0x645   : > { %v2541_v18 = vpop.f32.mrf.mxu1  ;;  %2683 = vmatpush1.msra.mxu0 %v5698_v16 }
 0x646   : > { %v5579_v29 = vadd.f32 %v2541_v18, %v2449_v17  ;;  %v5710_v18 = vld [vmem:[%s6090_s9 + $0x158] sm:$0xff] }
 0x647   : > { %v2543_v33 = vpop.f32.mrf.mxu1  ;;  %2684 = vmatprep.subr.mxu0 %v5710_v18 }
 0x648   : > { %v5581_v34 = vadd.f32 %v2543_v33, %v2453_v28  ;;  %v5722_v33 = vld [vmem:[%s6090_s9 + $0x150] sm:$0xff] }
 0x649   : > { %v2547_v35 = vpop.f32.mrf.mxu1  ;;  %2685 = vmatpush1.msra.mxu0 %v5722_v33 }
 0x64a   : > { %v5583_v36 = vadd.f32 %v2547_v35, %v2449_v17  ;;  %v5728_v35 = vld [vmem:[%s6090_s9 + $0xf8] sm:$0xff] }
 0x64b   : > { %v2549_v31 = vpop.f32.mrf.mxu1 }
 0x64c   : > { %6112 = vst [vmem:[#allocation3_spill] sm:$0xff] %v5583_v36  ;;  %v5585_v50 = vadd.f32 %v2549_v31, %v2453_v28  ;;  %v5734_v31 = vld [vmem:[%s6090_s9 + $0x148] sm:$0xff] }
 0x64d   : > { %v2553_v32 = vpop.f32.mrf.mxu1  ;;  %2686 = vmatprep.subr.mxu0 %v5734_v31 }
 0x64e   : > { %6113 = vst [vmem:[#allocation4_spill] sm:$0xff] %v5585_v50  ;;  %v5587_v53 = vadd.f32 %v2553_v32, %v2449_v17  ;;  %v5704_v17 = vld [vmem:[%s6090_s9 + $0x108] sm:$0xff]  ;;  %v5740_v32 = vld [vmem:[%s6090_s9 + $0xf0] sm:$0xff] }
 0x64f   : > { %v2555_v27 = vpop.f32.mrf.mxu1  ;;  %2754 = vmatprep.subr.mxu1 %v5704_v17 }
 0x650   : > { %6114 = vst [vmem:[#allocation5_spill] sm:$0xff] %v5587_v53  ;;  %v5589_v56 = vadd.f32 %v2555_v27, %v2453_v28  ;;  %v5716_v28 = vld [vmem:[%s6090_s9 + $0x100] sm:$0xff] }
 0x651   : > { %v2627_v59 = vpop.f32.mrf.mxu1  ;;  %v5746_v27 = vld [vmem:[%s6090_s9 + $0x140] sm:$0xff]  ;;  %2755 = vmatpush1.msra.mxu1 %v5716_v28 }
 0x652   : > { %6115 = vst [vmem:[#allocation6_spill] sm:$0xff] %v5589_v56  ;;  %v2632_v30 = vadd.f32 %v2627_v59, %v2536_v45  ;;  %v5752_v45 = vld [vmem:[%s6090_s9 + $0xe8] sm:$0xff]  ;;  %2756 = vmatprep.subr.mxu1 %v5728_v35  ;;  %v5761_v59 = vld [vmem:[%s6090_s9 + $0xe0] sm:$0xff]  ;;  %2687 = vmatpush1.msra.mxu0 %v5746_v27 }
 0x653   : > { %v2629_v58 = vpop.f32.mrf.mxu1  ;;  %6117 = vst [vmem:[#allocation8_spill] sm:$0xff] %v5752_v45  ;;  %2757 = vmatpush1.msra.mxu1 %v5740_v32  ;;  %6118 = vst [vmem:[#allocation9_spill] sm:$0xff] %v5761_v59  ;;  %2854 = vmatprep.subr.mxu0 %v5463_v41 }
 0x654   : > { %v3957_v47 = vmul.f32 -1.442695, %v2632_v30  ;;  %v5591_v25 = vadd.f32 %v2629_v58, %v2538_v61  ;;  %2758 = vmatprep.subr.mxu1 %v5752_v45  ;;  %v5768_v30 = vld [vmem:[%s6090_s9 + $0xd8] sm:$0xff]  ;;  %2721 = vmatmul.mubr.f32.vlgmr.msra.gmra.mxu0 %v6093_v23  ;;  %v5782_v58 = vld [vmem:[%s6090_s9 + $0xc8] sm:$0xff]  ;;  %v5789_v61 = vld [vmem:[%s6090_s9 + $0xc0] sm:$0xff] }
 0x655   : > { %6119 = vst [vmem:[#allocation10_spill] sm:$0xff] %v5768_v30  ;;  %2855 = vmatpush1.msra.mxu0 %v5470_v1  ;;  %2759 = vmatpush1.msra.mxu1 %v5761_v59  ;;  %6121 = vst [vmem:[#allocation12_spill] sm:$0xff] %v5782_v58 }
 0x656   : > { %4725 = vpow2.f32 %v3957_v47  ;;  %v5775_v47 = vld [vmem:[%s6090_s9 + $0xd0] sm:$0xff]  ;;  %2856 = vmatprep.subr.mxu0 %v5475_v54  ;;  %2760 = vmatprep.subr.mxu1 %v5768_v30  ;;  %6122 = vst [vmem:[#allocation13_spill] sm:$0xff] %v5789_v61 }
 0x657   : > { %4727 = vtanh.f32 %v5591_v25  ;;  %6120 = vst [vmem:[#allocation11_spill] sm:$0xff] %v5775_v47  ;;  %2857 = vmatpush1.msra.mxu0 %v5481_v2  ;;  %2761 = vmatpush1.msra.mxu1 %v5775_v47 }
 0x658   : > { %2858 = vmatprep.subr.mxu0 %v5488_v22  ;;  %2762 = vmatprep.subr.mxu1 %v5782_v58 }
 0x659   : > { %2859 = vmatpush1.msra.mxu0 %v5494_v49  ;;  %2763 = vmatpush1.msra.mxu1 %v5789_v61 }
 0x65a   : > { %2860 = vmatprep.subr.mxu0 %v5500_v37  ;;  %2902 = vmatprep.mubr.f32.mxu0 %v6093_v23 }
 0x65b   : > { %2861 = vmatpush1.msra.mxu0 %v5507_v51  ;;  %2954 = vmatprep.subr.mxu1 %v5601_v55 }
 0x65c   : > { %2862 = vmatprep.subr.mxu0 %v5514_v20 }
 0x65d   : > { %2863 = vmatpush1.msra.mxu0 %v5520_v46 }
 0x65e   : > { %2864 = vmatprep.subr.mxu0 %v5526_v4 }
 0x65f   : > { %2865 = vmatpush1.msra.mxu0 %v5533_v48 }
 0x660   : > { %2866 = vmatprep.subr.mxu0 %v5540_v5 }
 0x661   : > { %2867 = vmatpush1.msra.mxu0 %v5546_v7 }
 0x662   : > { %2868 = vmatprep.subr.mxu0 %v5552_v8 }
 0x663   : > { %v4726_v43 = vpop.eup %4725  ;;  %2869 = vmatpush1.msra.mxu0 %v5559_v9 }
 0x664   : > { %v2637_v60 = vadd.f32 1.0, %v4726_v43  ;;  %v4728_v62 = vpop.eup %4727  ;;  %3030 = vmatprep.subr.mxu0 %v5646_v39  ;;  %v3958_v43 = vmul.f32 -1.442695, %v5591_v25 }
 0x666   : > { %4729 = vrcp.f32 %v2637_v60 }
 0x667   : > { %4731 = vpow2.f32 %v3958_v43 }
 0x673   : > { %v5594_v26 = vpop.eup %4729 }
 0x674   : > { %v2648_v44 = vmul.f32 %v5594_v26, %v4728_v62  ;;  %v4732_v60 = vpop.eup %4731 }
 0x675   : > { %v2644_v62 = vadd.f32 1.0, %v4732_v60 }
 0x676   : > { %2650 = vrot.lane.b32.xlu0 %v2648_v44, %s4830_s20  ;;  %v2647_v44 = vmul.f32 0.0, %v5594_v26 }
 0x677   : > { %4733 = vrcp.f32 %v2644_v62 }
 0x684   : > { %v4734_v56 = vpop.eup %4733 }
 0x6e8   : > { %v2651_v15 = vpop.permute.xlu0 %2650 }
 0x6e9   : > { %v5812_v23 = vadd.f32 %v2651_v15, %v2647_v44  ;;  %v6123_v15 = vmov 0.0  }
 0x6eb   : > { %4735 = vtanh.f32 %v5812_v23 }
 0x6f8   : > { %v4736_v53 = vpop.eup %4735 }
 0x6f9   : > { %v2655_v50 = vmul.f32 %v4736_v53, %v4734_v56 }
 0x6fb   : > { %2728 = vrot.lane.b32.xlu0 %v2655_v50, %s4830_s20  ;;  %v3951_v50 = vld [vmem:[%s6090_s9 + $0x1d0] ss:$8 sm:$0x3] }
 0x6fc   : > { %v5856_v56 = vrot.slane %v3951_v50, %v5570_v12 }
 0x6fe   : > { %6124 = vst [vmem:[#allocation14_spill] sm:$0xff] %v5856_v56 }
 0x76d   : > { %v2729_v36 = vpop.permute.xlu0 %2728 }
 0x76e   : > { %3959 = vmatmul.mubr.msk.f32.vlgmr.msra.gmra.mxu1 %vm1496_vm2, %v2729_v36  ;;  %3962 = vmatmul.mubr.msk.f32.vlgmr.msra.gmra.mxu0 %vm1496_vm2, %v2729_v36  ;;  %v2722_v36 = vpop.f32.mrf.mxu0 }
 0x76f   : > { %2955 = vmatpush1.msra.mxu1 %v5606_v63  ;;  %3031 = vmatpush1.msra.mxu0 %v5651_v40 }
 0x770   : > { %2956 = vmatprep.subr.mxu1 %v5611_v57  ;;  %3032 = vmatprep.subr.mxu0 %v5663_v19  ;;  %v2724_v53 = vpop.f32.mrf.mxu0 }
 0x771   : > { %2957 = vmatpush1.msra.mxu1 %v5617_v0  ;;  %3033 = vmatpush1.msra.mxu0 %v5668_v38 }
 0x772   : > { %2958 = vmatprep.subr.mxu1 %v5623_v24  ;;  %3034 = vmatprep.subr.mxu0 %v5680_v10 }
 0x773   : > { %2959 = vmatpush1.msra.mxu1 %v5629_v42  ;;  %3035 = vmatpush1.msra.mxu0 %v5692_v14 }
 0x774   : > { %2960 = vmatprep.subr.mxu1 %v5635_v52  ;;  %3036 = vmatprep.subr.mxu0 %v5704_v17 }
 0x775   : > { %2961 = vmatpush1.msra.mxu1 %v5641_v21  ;;  %3037 = vmatpush1.msra.mxu0 %v5716_v28 }
 0x776   : > { %2962 = vmatprep.subr.mxu1 %v5657_v3  ;;  %3038 = vmatprep.subr.mxu0 %v5728_v35 }
 0x777   : > { %2963 = vmatpush1.msra.mxu1 %v5674_v6  ;;  %3039 = vmatpush1.msra.mxu0 %v5740_v32 }
 0x778   : > { %2964 = vmatprep.subr.mxu1 %v5686_v13  ;;  %3040 = vmatprep.subr.mxu0 %v5752_v45 }
 0x779   : > { %2965 = vmatpush1.msra.mxu1 %v5698_v16  ;;  %3002 = vmatprep.mubr.f32.mxu1 %v6123_v15 }
 0x77a   : > { %2966 = vmatprep.subr.mxu1 %v5710_v18  ;;  %3041 = vmatpush1.msra.mxu0 %v5761_v59 }
 0x77b   : > { %2967 = vmatpush1.msra.mxu1 %v5722_v33  ;;  %3042 = vmatprep.subr.mxu0 %v5768_v30  ;;  %v6125_v30 = vsub.s32 1, %v5567_v11 }
 0x77c   : > { %2968 = vmatprep.subr.mxu1 %v5734_v31  ;;  %3043 = vmatpush1.msra.mxu0 %v5775_v47 }
 0x77d   : > { %2969 = vmatpush1.msra.mxu1 %v5746_v27  ;;  %3044 = vmatprep.subr.mxu0 %v5782_v58  ;;  %v5862_v59 = vrot.slane %v3951_v50, %v6125_v30 }
 0x77e   : > { %3125 = vmatprep.subr.mxu1 %v5463_v41  ;;  %3045 = vmatpush1.msra.mxu0 %v5789_v61 }
 0x77f   : > { %3078 = vmatprep.mubr.f32.mxu0 %v6123_v15  ;;  %3225 = vmatprep.subr.mxu0 %v5601_v55 }
 0x82e   : > { %v2798_v25 = vpop.f32.mrf.mxu1  ;;  %v2904_v26 = vpop.f32.mrf.mxu0 }
 0x82f   : > { %v2799_v43 = vadd.f32 %v2798_v25, %v2722_v36  ;;  %v2909_v60 = vadd.f32 %v2904_v26, %v5579_v29 }
 0x830   : > { %v2800_v55 = vpop.f32.mrf.mxu1  ;;  %v2906_v58 = vpop.f32.mrf.mxu0 }
 0x831   : > { %v2814_v62 = vadd.f32 %v5856_v56, %v2799_v43  ;;  %v3963_v44 = vmul.f32 -1.442695, %v2909_v60  ;;  %v2801_v47 = vadd.f32 %v2800_v55, %v2724_v53  ;;  %v2910_v12 = vadd.f32 %v2906_v58, %v5581_v34 }
 0x833   : > { %v3960_v61 = vmul.f32 -1.442695, %v2814_v62  ;;  %4737 = vpow2.f32 %v3963_v44  ;;  %v2815_v36 = vadd.f32 %v5862_v59, %v2801_v47  ;;  %v3964_v30 = vmul.f32 -1.442695, %v2910_v12 }
 0x835   : > { %4739 = vpow2.f32 %v3960_v61  ;;  %v3961_v34 = vmul.f32 -1.442695, %v2815_v36 }
 0x836   : > { %4741 = vtanh.f32 %v2910_v12 }
 0x840   : > { %v4738_v45 = vpop.eup %4737 }
 0x841   : > { %v2914_v25 = vadd.f32 1.0, %v4738_v45 }
 0x842   : > { %v4740_v29 = vpop.eup %4739 }
 0x843   : > { %v2819_v26 = vadd.f32 1.0, %v4740_v29  ;;  %4743 = vrcp.f32 %v2914_v25  ;;  %v4742_v61 = vpop.eup %4741 }
 0x844   : > { %4745 = vtanh.f32 %v2815_v36 }
 0x845   : > { %4747 = vrcp.f32 %v2819_v26 }
 0x846   : > { %4749 = vpow2.f32 %v3961_v34 }
 0x847   : > { %4751 = vpow2.f32 %v3964_v30  ;;  %v6127_v30 = vld [vmem:[#allocation9_spill] sm:$0xff] }
 0x850   : > { %v4744_v43 = vpop.eup %4743 }
 0x851   : > { %v4746_v60 = vpop.eup %4745  ;;  %v2925_v55 = vmul.f32 %v4744_v43, %v4742_v61  ;;  %v2924_v29 = vmul.f32 %v4744_v43, %v5812_v23  ;;  %v6126_v43 = vld [vmem:[#allocation8_spill] sm:$0xff] }
 0x852   : > { %v4748_v53 = vpop.eup %4747 }
 0x853   : > { %v2830_v11 = vmul.f32 %v4748_v53, %v4746_v60  ;;  %v4750_v45 = vpop.eup %4749  ;;  %v2829_v50 = vmul.f32 0.0, %v4748_v53 }
 0x854   : > { %v2826_v47 = vadd.f32 1.0, %v4750_v45  ;;  %v4752_v58 = vpop.eup %4751  ;;  %v6128_v45 = vld [vmem:[#allocation10_spill] sm:$0xff] }
 0x855   : > { %2832 = vrot.lane.b32.xlu1 %v2830_v11, %s4830_s20  ;;  %v2921_v25 = vadd.f32 1.0, %v4752_v58  ;;  %v6130_v58 = vld [vmem:[#allocation12_spill] sm:$0xff] }
 0x856   : > { %4753 = vrcp.f32 %v2826_v47  ;;  %v6129_v47 = vld [vmem:[#allocation11_spill] sm:$0xff] }
 0x859   : > { %2927 = vrot.lane.b32.xlu1 %v2925_v55, %s4830_s20 }
 0x863   : > { %v4754_v12 = vpop.eup %4753 }
 0x8c7   : > { %v2833_v62 = vpop.permute.xlu1 %2832 }
 0x8c8   : > { %v5868_v44 = vadd.f32 %v2833_v62, %v2829_v50  ;;  %v6131_v50 = vld [vmem:[#allocation13_spill] sm:$0xff] }
 0x8ca   : > { %4755 = vtanh.f32 %v5868_v44 }
 0x8cb   : > { %v2928_v26 = vpop.permute.xlu1 %2927  ;;  %4757 = vrcp.f32 %v2921_v25 }
 0x8cc   : > { %v5872_v61 = vadd.f32 %v2928_v26, %v2924_v29 }
 0x8ce   : > { %4759 = vtanh.f32 %v5872_v61 }
 0x8d7   : > { %v4756_v36 = vpop.eup %4755 }
 0x8d8   : > { %v2837_v60 = vmul.f32 %v4756_v36, %v4754_v12  ;;  %v4758_v55 = vpop.eup %4757 }
 0x8da   : > { %2934 = vrot.lane.b32.xlu0 %v2837_v60, %s4830_s20 }
 0x8db   : > { %v4760_v53 = vpop.eup %4759 }
 0x8dc   : > { %v2932_v11 = vmul.f32 %v4760_v53, %v4758_v55  ;;  %v6133_v53 = vld [vmem:[#allocation3_spill] sm:$0xff] }
 0x8de   : > { %3010 = vrot.lane.b32.xlu1 %v2932_v11, %s4830_s20 }
 0x94c   : > { %v2935_v34 = vpop.permute.xlu0 %2934 }
 0x94d   : > { %3965 = vmatmul.mubr.msk.f32.vlgmr.msra.gmra.mxu1 %vm1496_vm2, %v2935_v34 }
 0x94e   : > { %3126 = vmatpush1.msra.mxu1 %v5470_v1  ;;  %3173 = vmatprep.mubr.f32.mxu1 %v6123_v15 }
 0x94f   : > { %3127 = vmatprep.subr.mxu1 %v5475_v54 }
 0x950   : > { %3128 = vmatpush1.msra.mxu1 %v5481_v2  ;;  %v3011_v23 = vpop.permute.xlu1 %3010 }
 0x951   : > { %3129 = vmatprep.subr.mxu1 %v5488_v22  ;;  %3966 = vmatmul.mubr.msk.f32.vlgmr.msra.gmra.mxu0 %vm1496_vm2, %v3011_v23 }
 0x952   : > { %3130 = vmatpush1.msra.mxu1 %v5494_v49  ;;  %3226 = vmatpush1.msra.mxu0 %v5606_v63 }
 0x953   : > { %3131 = vmatprep.subr.mxu1 %v5500_v37  ;;  %3227 = vmatprep.subr.mxu0 %v5611_v57 }
 0x954   : > { %3132 = vmatpush1.msra.mxu1 %v5507_v51  ;;  %3228 = vmatpush1.msra.mxu0 %v5617_v0 }
 0x955   : > { %3133 = vmatprep.subr.mxu1 %v5514_v20  ;;  %3229 = vmatprep.subr.mxu0 %v5623_v24 }
 0x956   : > { %3134 = vmatpush1.msra.mxu1 %v5520_v46  ;;  %3230 = vmatpush1.msra.mxu0 %v5629_v42 }
 0x957   : > { %3135 = vmatprep.subr.mxu1 %v5526_v4  ;;  %3231 = vmatprep.subr.mxu0 %v5635_v52 }
 0x958   : > { %3136 = vmatpush1.msra.mxu1 %v5533_v48  ;;  %3232 = vmatpush1.msra.mxu0 %v5641_v21 }
 0x959   : > { %3137 = vmatprep.subr.mxu1 %v5540_v5  ;;  %3233 = vmatprep.subr.mxu0 %v5657_v3 }
 0x95a   : > { %3138 = vmatpush1.msra.mxu1 %v5546_v7  ;;  %3234 = vmatpush1.msra.mxu0 %v5674_v6 }
 0x95b   : > { %3139 = vmatprep.subr.mxu1 %v5552_v8  ;;  %3235 = vmatprep.subr.mxu0 %v5686_v13 }
 0x95c   : > { %3140 = vmatpush1.msra.mxu1 %v5559_v9  ;;  %3236 = vmatpush1.msra.mxu0 %v5698_v16 }
 0x95d   : > { %3969 = vmatmul.mubr.msk.f32.vlgmr.msra.gmra.mxu1 %vm1496_vm2, %v3011_v23  ;;  %3301 = vmatprep.subr.mxu1 %v5646_v39 }
 0x95e   : > { %3302 = vmatpush1.msra.mxu1 %v5651_v40  ;;  %3237 = vmatprep.subr.mxu0 %v5710_v18 }
 0x95f   : > { %3303 = vmatprep.subr.mxu1 %v5663_v19  ;;  %3238 = vmatpush1.msra.mxu0 %v5722_v33 }
 0x960   : > { %3304 = vmatpush1.msra.mxu1 %v5668_v38  ;;  %3239 = vmatprep.subr.mxu0 %v5734_v31 }
 0x961   : > { %3305 = vmatprep.subr.mxu1 %v5680_v10  ;;  %3240 = vmatpush1.msra.mxu0 %v5746_v27 }
 0x962   : > { %3306 = vmatpush1.msra.mxu1 %v5692_v14  ;;  %3273 = vmatprep.mubr.f32.mxu0 %v6123_v15 }
 0x963   : > { %3307 = vmatprep.subr.mxu1 %v5704_v17  ;;  %3396 = vmatprep.subr.mxu0 %v5463_v41  ;;  %v6132_v41 = vld [vmem:[#allocation7_spill] sm:$0xff] }
 0x964   : > { %3308 = vmatpush1.msra.mxu1 %v5716_v28  ;;  %3349 = vmatprep.mubr.f32.mxu1 %v6123_v15 }
 0x965   : > { %3309 = vmatprep.subr.mxu1 %v5728_v35 }
 0x966   : > { %3310 = vmatpush1.msra.mxu1 %v5740_v32 }
 0x967   : > { %3311 = vmatprep.subr.mxu1 %v6126_v43 }
 0x968   : > { %3312 = vmatpush1.msra.mxu1 %v6127_v30 }
 0x969   : > { %3313 = vmatprep.subr.mxu1 %v6128_v45 }
 0x96a   : > { %3314 = vmatpush1.msra.mxu1 %v6129_v47 }
 0x96b   : > { %3315 = vmatprep.subr.mxu1 %v6130_v58 }
 0x96c   : > { %3316 = vmatpush1.msra.mxu1 %v6131_v50 }
 0x96d   : > { %3496 = vmatprep.subr.mxu1 %v6132_v41 }
 0xa0d   : > { %v3004_v62 = vpop.f32.mrf.mxu1 }
 0xa0f   : > { %v3006_v36 = vpop.f32.mrf.mxu1 }
 0xa11   : > { %v3080_v25 = vpop.f32.mrf.mxu0 }
 0xa12   : > { %v3081_v29 = vadd.f32 %v3080_v25, %v3004_v62  ;;  %v6134_v62 = vld [vmem:[#allocation4_spill] sm:$0xff] }
 0xa13   : > { %v3082_v60 = vpop.f32.mrf.mxu0 }
 0xa14   : > { %v3085_v26 = vadd.f32 %v3081_v29, %v5856_v56  ;;  %v3083_v34 = vadd.f32 %v3082_v60, %v3006_v36 }
 0xa16   : > { %v3967_v12 = vmul.f32 -1.442695, %v3085_v26  ;;  %v3086_v58 = vadd.f32 %v3083_v34, %v5862_v59 }
 0xa18   : > { %4761 = vpow2.f32 %v3967_v12 }
 0xa1d   : > { %v3175_v55 = vpop.f32.mrf.mxu1 }
 0xa1e   : > { %v3180_v11 = vadd.f32 %v3175_v55, %v6133_v53 }
 0xa1f   : > { %v3177_v41 = vpop.f32.mrf.mxu1 }
 0xa20   : > { %v3970_v23 = vmul.f32 -1.442695, %v3180_v11  ;;  %v3181_v25 = vadd.f32 %v3177_v41, %v6134_v62 }
 0xa22   : > { %4763 = vpow2.f32 %v3970_v23 }
 0xa23   : > { %4765 = vtanh.f32 %v3086_v58 }
 0xa25   : > { %v4762_v50 = vpop.eup %4761 }
 0xa26   : > { %v3090_v47 = vadd.f32 1.0, %v4762_v50  ;;  %v3968_v50 = vmul.f32 -1.442695, %v3086_v58 }
 0xa28   : > { %4767 = vrcp.f32 %v3090_v47  ;;  %v3971_v47 = vmul.f32 -1.442695, %v3181_v25 }
 0xa29   : > { %4769 = vtanh.f32 %v3181_v25 }
 0xa2f   : > { %v4764_v29 = vpop.eup %4763 }
 0xa30   : > { %v3185_v26 = vadd.f32 1.0, %v4764_v29  ;;  %v4766_v12 = vpop.eup %4765 }
 0xa32   : > { %4771 = vrcp.f32 %v3185_v26 }
 0xa33   : > { %4773 = vpow2.f32 %v3968_v50 }
 0xa34   : > { %4775 = vpow2.f32 %v3971_v47 }
 0xa35   : > { %v4768_v56 = vpop.eup %4767 }
 0xa36   : > { %v3101_v45 = vmul.f32 %v4768_v56, %v4766_v12  ;;  %v4770_v36 = vpop.eup %4769  ;;  %v3100_v34 = vmul.f32 %v4768_v56, %v5868_v44 }
 0xa38   : > { %3103 = vrot.lane.b32.xlu0 %v3101_v45, %s4830_s20 }
 0xa3f   : > { %v4772_v60 = vpop.eup %4771 }
 0xa40   : > { %v3196_v55 = vmul.f32 %v4772_v60, %v4770_v36  ;;  %v4774_v53 = vpop.eup %4773  ;;  %v3195_v29 = vmul.f32 %v4772_v60, %v5872_v61 }
 0xa41   : > { %v3097_v11 = vadd.f32 1.0, %v4774_v53  ;;  %v4776_v45 = vpop.eup %4775 }
 0xa42   : > { %3198 = vrot.lane.b32.xlu1 %v3196_v55, %s4830_s20  ;;  %v3192_v62 = vadd.f32 1.0, %v4776_v45 }
 0xa43   : > { %4777 = vrcp.f32 %v3097_v11 }
 0xa50   : > { %v4778_v58 = vpop.eup %4777 }
 0xaaa   : > { %v3104_v23 = vpop.permute.xlu0 %3103 }
 0xaab   : > { %v5938_v41 = vadd.f32 %v3104_v23, %v3100_v34 }
 0xaad   : > { %4779 = vtanh.f32 %v5938_v41 }
 0xaae   : > { %4781 = vrcp.f32 %v3192_v62 }
 0xab4   : > { %v3199_v26 = vpop.permute.xlu1 %3198 }
 0xab5   : > { %v5942_v12 = vadd.f32 %v3199_v26, %v3195_v29 }
 0xab7   : > { %4783 = vtanh.f32 %v5942_v12 }
 0xaba   : > { %v4780_v25 = vpop.eup %4779 }
 0xabb   : > { %v3108_v36 = vmul.f32 %v4780_v25, %v4778_v58  ;;  %v4782_v56 = vpop.eup %4781 }
 0xabd   : > { %3205 = vrot.lane.b32.xlu0 %v3108_v36, %s4830_s20 }
 0xac4   : > { %v4784_v44 = vpop.eup %4783 }
 0xac5   : > { %v3203_v55 = vmul.f32 %v4784_v44, %v4782_v56 }
 0xac7   : > { %3281 = vrot.lane.b32.xlu1 %v3203_v55, %s4830_s20 }
 0xb2f   : > { %v3206_v50 = vpop.permute.xlu0 %3205 }
 0xb30   : > { %3972 = vmatmul.mubr.msk.f32.vlgmr.msra.gmra.mxu0 %vm1496_vm2, %v3206_v50 }
 0xb31   : > { %3397 = vmatpush1.msra.mxu0 %v5470_v1  ;;  %3444 = vmatprep.mubr.f32.mxu0 %v6123_v15  ;;  %v6135_v1 = vld [vmem:[#allocation10_spill] sm:$0xff] }
 0xb32   : > { %3398 = vmatprep.subr.mxu0 %v5475_v54  ;;  %v6136_v54 = vld [vmem:[#allocation11_spill] sm:$0xff] }
 0xb33   : > { %3399 = vmatpush1.msra.mxu0 %v5481_v2  ;;  %v6137_v2 = vld [vmem:[#allocation12_spill] sm:$0xff] }
 0xb34   : > { %3400 = vmatprep.subr.mxu0 %v5488_v22  ;;  %v6138_v22 = vld [vmem:[#allocation13_spill] sm:$0xff] }
 0xb35   : > { %3401 = vmatpush1.msra.mxu0 %v5494_v49 }
 0xb36   : > { %3402 = vmatprep.subr.mxu0 %v5500_v37 }
 0xb37   : > { %3403 = vmatpush1.msra.mxu0 %v5507_v51 }
 0xb38   : > { %3404 = vmatprep.subr.mxu0 %v5514_v20  ;;  %v6139_v20 = vld [vmem:[#allocation14_spill] sm:$0xff] }
 0xb39   : > { %3405 = vmatpush1.msra.mxu0 %v5520_v46  ;;  %v3282_v61 = vpop.permute.xlu1 %3281 }
 0xb3a   : > { %3973 = vmatmul.mubr.msk.f32.vlgmr.msra.gmra.mxu1 %vm1496_vm2, %v3282_v61  ;;  %3406 = vmatprep.subr.mxu0 %v5526_v4 }
 0xb3b   : > { %3407 = vmatpush1.msra.mxu0 %v5533_v48  ;;  %3497 = vmatpush1.msra.mxu1 %v5606_v63 }
 0xb3c   : > { %3408 = vmatprep.subr.mxu0 %v5540_v5  ;;  %3498 = vmatprep.subr.mxu1 %v5611_v57 }
 0xb3d   : > { %3409 = vmatpush1.msra.mxu0 %v5546_v7  ;;  %3499 = vmatpush1.msra.mxu1 %v5617_v0  ;;  %v6140_v7 = vld [vmem:[#allocation5_spill] sm:$0xff] }
 0xb3e   : > { %3410 = vmatprep.subr.mxu0 %v5552_v8  ;;  %3500 = vmatprep.subr.mxu1 %v5623_v24 }
 0xb3f   : > { %3411 = vmatpush1.msra.mxu0 %v5559_v9  ;;  %3501 = vmatpush1.msra.mxu1 %v5629_v42 }
 0xb40   : > { %3976 = vmatmul.mubr.msk.f32.vlgmr.msra.gmra.mxu0 %vm1496_vm2, %v3282_v61  ;;  %3572 = vmatprep.subr.mxu0 %v5646_v39 }
 0xb41   : > { %3573 = vmatpush1.msra.mxu0 %v5651_v40  ;;  %3502 = vmatprep.subr.mxu1 %v5635_v52 }
 0xb42   : > { %3574 = vmatprep.subr.mxu0 %v5663_v19  ;;  %3503 = vmatpush1.msra.mxu1 %v5641_v21  ;;  %v6141_v21 = vld [vmem:[#allocation6_spill] sm:$0xff] }
 0xb43   : > { %3575 = vmatpush1.msra.mxu0 %v5668_v38  ;;  %3504 = vmatprep.subr.mxu1 %v5657_v3 }
 0xb44   : > { %3576 = vmatprep.subr.mxu0 %v5680_v10  ;;  %3505 = vmatpush1.msra.mxu1 %v5674_v6 }
 0xb45   : > { %3577 = vmatpush1.msra.mxu0 %v5692_v14  ;;  %3506 = vmatprep.subr.mxu1 %v5686_v13 }
 0xb46   : > { %3578 = vmatprep.subr.mxu0 %v5704_v17  ;;  %3507 = vmatpush1.msra.mxu1 %v5698_v16 }
 0xb47   : > { %3579 = vmatpush1.msra.mxu0 %v5716_v28  ;;  %3508 = vmatprep.subr.mxu1 %v5710_v18 }
 0xb48   : > { %3580 = vmatprep.subr.mxu0 %v5728_v35  ;;  %3509 = vmatpush1.msra.mxu1 %v5722_v33 }
 0xb49   : > { %3581 = vmatpush1.msra.mxu0 %v5740_v32  ;;  %3510 = vmatprep.subr.mxu1 %v5734_v31 }
 0xb4a   : > { %3582 = vmatprep.subr.mxu0 %v6126_v43  ;;  %3511 = vmatpush1.msra.mxu1 %v5746_v27 }
 0xb4b   : > { %3544 = vmatprep.mubr.f32.mxu1 %v6123_v15  ;;  %3583 = vmatpush1.msra.mxu0 %v6127_v30 }
 0xb4c   : > { %3584 = vmatprep.subr.mxu0 %v6135_v1  ;;  %3620 = vmatprep.mubr.f32.mxu0 %v6123_v15 }
 0xb4d   : > { %3585 = vmatpush1.msra.mxu0 %v6136_v54 }
 0xb4e   : > { %3586 = vmatprep.subr.mxu0 %v6137_v2  ;;  %v2442_v2 = vld [vmem:[%s6090_s9 + $0x258] sm:$0xff] }
 0xb4f   : > { %3587 = vmatpush1.msra.mxu0 %v6138_v22  ;;  %v2441_v22 = vld [vmem:[%s6090_s9 + $0x250] sm:$0xff]  ;;  %3678 = vmatprep.subr.mxu1 %v2442_v2 }
 0xbf0   : > { %v3275_v49 = vpop.f32.mrf.mxu0 }
 0xbf2   : > { %v3277_v4 = vpop.f32.mrf.mxu0 }
 0xbfa   : > { %v3351_v37 = vpop.f32.mrf.mxu1 }
 0xbfb   : > { %v3352_v51 = vadd.f32 %v3351_v37, %v3275_v49  ;;  %v2439_v49 = vld [vmem:[%s6090_s9 + $0x240] sm:$0xff]  ;;  %v2438_v37 = vld [vmem:[%s6090_s9 + $0x238] sm:$0xff] }
 0xbfc   : > { %v3353_v63 = vpop.f32.mrf.mxu1 }
 0xbfd   : > { %v3356_v46 = vadd.f32 %v3352_v51, %v6139_v20  ;;  %v3354_v57 = vadd.f32 %v3353_v63, %v3277_v4  ;;  %v2437_v51 = vld [vmem:[%s6090_s9 + $0x230] sm:$0xff]  ;;  %v2434_v4 = vld [vmem:[%s6090_s9 + $0x218] sm:$0xff]  ;;  %v2428_v63 = vld [vmem:[%s6090_s9 + $0x1e8] sm:$0xff] }
 0xbff   : > { %v3974_v48 = vmul.f32 -1.442695, %v3356_v46  ;;  %v3357_v0 = vadd.f32 %v3354_v57, %v5862_v59  ;;  %v2435_v46 = vld [vmem:[%s6090_s9 + $0x220] sm:$0xff] }
 0xc00   : > { %v3446_v5 = vpop.f32.mrf.mxu0  ;;  %v2427_v57 = vld [vmem:[%s6090_s9 + $0x1e0] sm:$0xff] }
 0xc01   : > { %4785 = vpow2.f32 %v3974_v48  ;;  %v3451_v8 = vadd.f32 %v3446_v5, %v6140_v7  ;;  %v3975_v16 = vmul.f32 -1.442695, %v3357_v0  ;;  %v2433_v48 = vld [vmem:[%s6090_s9 + $0x210] sm:$0xff]  ;;  %v2432_v5 = vld [vmem:[%s6090_s9 + $0x208] sm:$0xff]  ;;  %v2431_v7 = vld [vmem:[%s6090_s9 + $0x200] sm:$0xff] }
 0xc02   : > { %v3448_v24 = vpop.f32.mrf.mxu0 }
 0xc03   : > { %v3977_v9 = vmul.f32 -1.442695, %v3451_v8  ;;  %v3452_v39 = vadd.f32 %v3448_v24, %v6141_v21  ;;  %v2430_v8 = vld [vmem:[%s6090_s9 + $0x1f8] sm:$0xff] }
 0xc05   : > { %4787 = vpow2.f32 %v3977_v9  ;;  %v3978_v17 = vmul.f32 -1.442695, %v3452_v39  ;;  %v2429_v9 = vld [vmem:[%s6090_s9 + $0x1f0] sm:$0xff] }
 0xc06   : > { %4789 = vtanh.f32 %v3357_v0 }
 0xc0e   : > { %v4786_v42 = vpop.eup %4785 }
 0xc0f   : > { %v3361_v52 = vadd.f32 1.0, %v4786_v42 }
 0xc11   : > { %4791 = vrcp.f32 %v3361_v52 }
 0xc12   : > { %v4788_v40 = vpop.eup %4787  ;;  %4793 = vtanh.f32 %v3452_v39 }
 0xc13   : > { %v3456_v3 = vadd.f32 1.0, %v4788_v40  ;;  %v4790_v19 = vpop.eup %4789 }
 0xc15   : > { %4795 = vrcp.f32 %v3456_v3 }
 0xc16   : > { %4797 = vpow2.f32 %v3975_v16 }
 0xc17   : > { %4799 = vpow2.f32 %v3978_v17 }
 0xc1e   : > { %v4792_v38 = vpop.eup %4791 }
 0xc1f   : > { %v3372_v6 = vmul.f32 %v4792_v38, %v4790_v19  ;;  %v4794_v10 = vpop.eup %4793  ;;  %v3371_v35 = vmul.f32 %v4792_v38, %v5938_v41 }
 0xc21   : > { %3374 = vrot.lane.b32.xlu0 %v3372_v6, %s4830_s20  ;;  %v3952_v6 = vld [vmem:[%s6090_s9 + $0x260] ss:$8 sm:$0x3] }
 0xc22   : > { %v4796_v13 = vpop.eup %4795 }
 0xc23   : > { %v3467_v14 = vmul.f32 %v4796_v13, %v4794_v10  ;;  %v4798_v18 = vpop.eup %4797  ;;  %v3466_v43 = vmul.f32 %v4796_v13, %v5942_v12  ;;  %v6142_v10 = vld [vmem:[#allocation2_spill] sm:$0xff] }
 0xc24   : > { %v3368_v28 = vadd.f32 1.0, %v4798_v18  ;;  %v4800_v33 = vpop.eup %4799  ;;  %v3655_v13 = vrot.slane %v3952_v6, %v6142_v10 }
 0xc25   : > { %3469 = vrot.lane.b32.xlu1 %v3467_v14, %s4830_s20  ;;  %v3463_v27 = vadd.f32 1.0, %v4800_v33 }
 0xc26   : > { %4801 = vrcp.f32 %v3368_v28 }
 0xc33   : > { %v4802_v47 = vpop.eup %4801 }
 0xc93   : > { %v3375_v31 = vpop.permute.xlu0 %3374 }
 0xc94   : > { %v6006_v32 = vadd.f32 %v3375_v31, %v3371_v35 }
 0xc96   : > { %4803 = vtanh.f32 %v6006_v32 }
 0xc97   : > { %v3470_v30 = vpop.permute.xlu1 %3469  ;;  %4805 = vrcp.f32 %v3463_v27 }
 0xc98   : > { %v3472_v60 = vadd.f32 %v3470_v30, %v3466_v43 }
 0xc9a   : > { %4807 = vtanh.f32 %v3472_v60 }
 0xca3   : > { %v4804_v53 = vpop.eup %4803 }
 0xca4   : > { %v3379_v11 = vmul.f32 %v4804_v53, %v4802_v47  ;;  %v4806_v34 = vpop.eup %4805 }
 0xca6   : > { %3476 = vrot.lane.b32.xlu0 %v3379_v11, %s4830_s20 }
 0xca7   : > { %v4808_v23 = vpop.eup %4807 }
 0xca8   : > { %v3474_v41 = vmul.f32 %v4808_v23, %v4806_v34 }
 0xcaa   : > { %3552 = vrot.lane.b32.xlu1 %v3474_v41, %s4830_s20 }
 0xd18   : > { %v3477_v45 = vpop.permute.xlu0 %3476 }
 0xd19   : > { %3979 = vmatmul.mubr.msk.f32.vlgmr.msra.gmra.mxu1 %vm1496_vm2, %v3477_v45 }
 0xd1a   : > { %3726 = vmatprep.mubr.f32.mxu1 %v6123_v15  ;;  %3679 = vmatpush1.msra.mxu1 %v2441_v22 }
 0xd1c   : > { %v3553_v62 = vpop.permute.xlu1 %3552 }
 0xd1d   : > { %3980 = vmatmul.mubr.msk.f32.vlgmr.msra.gmra.mxu0 %vm1496_vm2, %v3553_v62 }
 0xdd9   : > { %v3546_v29 = vpop.f32.mrf.mxu1 }
 0xddb   : > { %v3548_v56 = vpop.f32.mrf.mxu1 }
 0xddd   : > { %v3622_v26 = vpop.f32.mrf.mxu0 }
 0xdde   : > { %v3623_v12 = vadd.f32 %v3622_v26, %v3546_v29 }
 0xddf   : > { %v3624_v36 = vpop.f32.mrf.mxu0 }
 0xde0   : > { %v3627_v58 = vadd.f32 %v3623_v12, %v6139_v20  ;;  %v3625_v44 = vadd.f32 %v3624_v36, %v3548_v56  ;;  %v2436_v20 = vld [vmem:[%s6090_s9 + $0x228] sm:$0xff] }
 0xde2   : > { %v3981_v25 = vmul.f32 -1.442695, %v3627_v58  ;;  %v3628_v55 = vadd.f32 %v3625_v44, %v5862_v59  ;;  %v2440_v59 = vld [vmem:[%s6090_s9 + $0x248] sm:$0xff] }
 0xde3   : > { %3680 = vmatprep.subr.mxu1 %v2440_v59 }
 0xde4   : > { %4809 = vpow2.f32 %v3981_v25  ;;  %3681 = vmatpush1.msra.mxu1 %v2439_v49  ;;  %v3982_v0 = vmul.f32 -1.442695, %v3628_v55 }
 0xde5   : > { %4811 = vtanh.f32 %v3628_v55  ;;  %3682 = vmatprep.subr.mxu1 %v2438_v37 }
 0xde6   : > { %3683 = vmatpush1.msra.mxu1 %v2437_v51 }
 0xde7   : > { %3684 = vmatprep.subr.mxu1 %v2436_v20 }
 0xde8   : > { %3685 = vmatpush1.msra.mxu1 %v2435_v46 }
 0xde9   : > { %3686 = vmatprep.subr.mxu1 %v2434_v4 }
 0xdea   : > { %3687 = vmatpush1.msra.mxu1 %v2433_v48 }
 0xdeb   : > { %3688 = vmatprep.subr.mxu1 %v2432_v5 }
 0xdec   : > { %3689 = vmatpush1.msra.mxu1 %v2431_v7 }
 0xded   : > { %3690 = vmatprep.subr.mxu1 %v2430_v8 }
 0xdee   : > { %3691 = vmatpush1.msra.mxu1 %v2429_v9 }
 0xdef   : > { %3692 = vmatprep.subr.mxu1 %v2428_v63 }
 0xdf0   : > { %3693 = vmatpush1.msra.mxu1 %v2427_v57 }
 0xdf1   : > { %v4810_v50 = vpop.eup %4809 }
 0xdf2   : > { %v3632_v61 = vadd.f32 1.0, %v4810_v50  ;;  %v4812_v15 = vpop.eup %4811 }
 0xdf4   : > { %4813 = vrcp.f32 %v3632_v61 }
 0xdf5   : > { %4815 = vpow2.f32 %v3982_v0 }
 0xe01   : > { %v4814_v1 = vpop.eup %4813 }
 0xe02   : > { %v3643_v54 = vmul.f32 %v4814_v1, %v4812_v15  ;;  %v4816_v24 = vpop.eup %4815  ;;  %v3642_v52 = vmul.f32 %v4814_v1, %v6006_v32 }
 0xe03   : > { %v3639_v42 = vadd.f32 1.0, %v4816_v24 }
 0xe04   : > { %3645 = vrot.lane.b32.xlu0 %v3643_v54, %s4830_s20 }
 0xe05   : > { %4817 = vrcp.f32 %v3639_v42 }
 0xe12   : > { %v4818_v40 = vpop.eup %4817 }
 0xe76   : > { %v3646_v21 = vpop.permute.xlu0 %3645 }
 0xe77   : > { %v3648_v39 = vadd.f32 %v3646_v21, %v3642_v52 }
 0xe79   : > { %4819 = vtanh.f32 %v3648_v39 }
 0xe86   : > { %v4820_v3 = vpop.eup %4819 }
 0xe87   : > { %v3650_v19 = vmul.f32 %v4820_v3, %v4818_v40 }
 0xe89   : > { %3658 = vrot.lane.b32.xlu1 %v3650_v19, %s4830_s20 }
 0xefb   : > { %v3659_v38 = vpop.permute.xlu1 %3658 }
 0xefc   : > { %3983 = vmatmul.mubr.msk.f32.vlgmr.msra.gmra.mxu1 %vm1496_vm2, %v3659_v38 }
 0xfbc   : > { %v3728_v14 = vpop.f32.mrf.mxu1 }
 0xfbd   : > { %v3729_v16 = vadd.f32 %v3728_v14, %v3655_v13 }
 0xfbe   : > { %v3730_v17 = vpop.f32.mrf.mxu1 }
 0xfbf   : > { %3733 = vst.msk [vmem:[%s359_s22] sm:$0xff] %vm3732_vm4, %v3729_v16 }
 0xfc0 PF: > { %s20_s13 = sadd.s32 1, %s4827_s13  }
 0xfc1   : > { %p17_p5 = scmp.ge.s32.totalorder %s20_s13, 4  }
 0xfc3   :  { %19 = sbr.rel (!%p17_p5) target bundleno = 1 (0x1), region = 101 }

</bundles_post_ra>
